<compile_context>
chip_gen: v7x
topology: tpu7x:2x2x1
jax: 0.10.0
libtpu: 0.0.40
codegen_flags: <defaults>
</compile_context>

<pallas_src>
import functools

import jax
import jax.numpy as jnp
import numpy as np
from jax.experimental import pallas as pl
from jax.experimental.pallas import tpu as pltpu


def _round_up(x, m):
    return (x + m - 1) // m * m


def _drnn_kernel(T, BP, has_dropout, mxu_dtype, unroll_full, *refs):
    if has_dropout:
        (x_ref, wih_ref, whh_ref, b_ref, wout_ref, bout_ref, mask_ref,
         out_ref, gin_ref, hbuf_ref) = refs
    else:
        (x_ref, wih_ref, whh_ref, b_ref, wout_ref, bout_ref,
         out_ref, gin_ref, hbuf_ref) = refs
        mask_ref = None

    HP = hbuf_ref.shape[-1]            # lane-padded hidden width (multiple of 128)

    # Input + fused-bias contribution for ALL timesteps in one VPU pass:
    #   gin[t*BP + b, :] = x[b, t] * W_ih_row + (b_ih + b_hh)      (I == 1)
    gin_ref[...] = x_ref[...] * wih_ref[...] + b_ref[...]

    def cell(gin, h_prev, c_prev, mask):
        # Recurrent term: (BP, HP) @ (HP, 4*HP), bf16 operands, f32 accumulation.
        gates = gin + jnp.dot(h_prev.astype(mxu_dtype), whh_ref[...],
                              preferred_element_type=jnp.float32)
        # Each gate owns a 128-aligned lane block -> vreg-aligned slices, no shuffles.
        i_g = jax.nn.sigmoid(gates[:, 0 * HP:1 * HP])
        f_g = jax.nn.sigmoid(gates[:, 1 * HP:2 * HP])
        g_g = jnp.tanh(gates[:, 2 * HP:3 * HP])
        o_g = jax.nn.sigmoid(gates[:, 3 * HP:4 * HP])
        c_new = f_g * c_prev + i_g * g_g
        h_new = o_g * jnp.tanh(c_new)
        if mask is not None:
            # Pre-generated inverted-dropout multiplier: one VPU mul on the chain.
            h_new = h_new * mask
        return h_new, c_new

    h = jnp.zeros((BP, HP), jnp.float32)
    c = jnp.zeros((BP, HP), jnp.float32)

    if unroll_full:
        # Straight-line code: h/c live in vregs; LLO can overlap adjacent steps.
        for t in range(T):
            mask = mask_ref[t * BP:(t + 1) * BP, :] if has_dropout else None
            h, c = cell(gin_ref[t * BP:(t + 1) * BP, :], h, c, mask)
            hbuf_ref[t * BP:(t + 1) * BP, :] = h             # one full-vreg store
    else:
        def body(t, carry):
            h_prev, c_prev = carry
            row = pl.multiple_of(t * BP, BP)                 # sublane-aligned start
            mask = mask_ref[pl.ds(row, BP), :] if has_dropout else None
            h_new, c_new = cell(gin_ref[pl.ds(row, BP), :], h_prev, c_prev, mask)
            hbuf_ref[pl.ds(row, BP), :] = h_new
            return h_new, c_new
        jax.lax.fori_loop(0, T, body, (h, c), unroll=8)

    # Linear head batched over all timesteps: one MXU pass + one lane-dense store.
    out_ref[...] = (jnp.dot(hbuf_ref[...].astype(mxu_dtype), wout_ref[...],
                            preferred_element_type=jnp.float32)
                    + bout_ref[...])


def drnn_forward(x, params, *, hidden_size, output_size, dropout_frac=0.0,
                 seed=0, mxu_bf16=True):
    """Pallas forward for DRNN. x: (B, T) float32 (input_size == 1)."""
    w_ih, w_hh, b_ih, b_hh, w_out, b_out = params            # PyTorch-shaped params
    if x.ndim == 2:
        x = x[..., None]
    B, T, I = x.shape
    if I != 1:
        # The torch module chunks a (B, T) input along dim=1 => input_size == 1.
        raise NotImplementedError("DRNN Pallas kernel implements input_size == 1")

    H, O = hidden_size, output_size
    HP = _round_up(max(H, 128), 128)       # lane-padded hidden width
    OP = _round_up(max(O, 128), 128)       # lane-padded output width
    BP = _round_up(max(B, 8), 8)           # sublane-padded batch
    GP = 4 * HP
    mxu_dtype = jnp.bfloat16 if mxu_bf16 else jnp.float32

    # ---- inputs: time-major, batch padded, flattened to lane-friendly 2-D ----
    xf = jnp.asarray(x, jnp.float32)[..., 0]                 # (B, T)
    xf = jnp.pad(xf, ((0, BP - B), (0, 0)))                  # (BP, T)
    x_flat = xf.T.reshape(T * BP, 1)                         # (T*BP, 1)

    # ---- weights: per-gate lane padding (gate order i,f,g,o preserved) ----
    def pad_gate_cols(w_t):                                  # (K, 4H) -> (K, 4*HP)
        blocks = [w_t[:, g * H:(g + 1) * H] for g in range(4)]
        return jnp.concatenate(
            [jnp.pad(blk, ((0, 0), (0, HP - H))) for blk in blocks], axis=1)

    wih_row = pad_gate_cols(jnp.asarray(w_ih, jnp.float32).T)                 # (1, GP)
    whh_pad = pad_gate_cols(
        jnp.pad(jnp.asarray(w_hh, jnp.float32).T,
                ((0, HP - H), (0, 0)))).astype(mxu_dtype)                     # (HP, GP)
    bias = pad_gate_cols((jnp.asarray(b_ih, jnp.float32)
                          + jnp.asarray(b_hh, jnp.float32))[None, :])         # (1, GP)
    wout_pad = jnp.pad(jnp.asarray(w_out, jnp.float32).T,
                       ((0, HP - H), (0, OP - O))).astype(mxu_dtype)          # (HP, OP)
    bout_pad = jnp.pad(jnp.asarray(b_out, jnp.float32)[None, :],
                       ((0, 0), (0, OP - O)))                                 # (1, OP)

    has_dropout = float(dropout_frac) > 0.0
    inputs = [x_flat, wih_row, whh_pad, bias, wout_pad, bout_pad]
    in_specs = [
        pl.BlockSpec((T * BP, 1), lambda i: (0, 0)),         # x (time-major)
        pl.BlockSpec((1, GP), lambda i: (0, 0)),             # W_ih row (padded)
        pl.BlockSpec((HP, GP), lambda i: (0, 0)),            # W_hh^T (padded, MXU dtype)
        pl.BlockSpec((1, GP), lambda i: (0, 0)),             # b_ih + b_hh
        pl.BlockSpec((HP, OP), lambda i: (0, 0)),            # W_out^T (padded, MXU dtype)
        pl.BlockSpec((1, OP), lambda i: (0, 0)),             # b_out
    ]
    if has_dropout:
        # Pre-generated inverted-dropout multiplier for every (t, b, h) element.
        if float(dropout_frac) >= 1.0:
            mask = jnp.zeros((T * BP, HP), jnp.float32)
        else:
            keep = jax.random.bernoulli(jax.random.PRNGKey(seed),
                                        1.0 - float(dropout_frac), (T * BP, HP))
            mask = keep.astype(jnp.float32) * (1.0 / (1.0 - float(dropout_frac)))
        inputs.append(mask)
        in_specs.append(pl.BlockSpec((T * BP, HP), lambda i: (0, 0)))

    unroll_full = T <= 128
    kernel = functools.partial(_drnn_kernel, T, BP, has_dropout, mxu_dtype,
                               unroll_full)

    out_flat = pl.pallas_call(
        kernel,
        out_shape=jax.ShapeDtypeStruct((T * BP, OP), jnp.float32),
        grid_spec=pltpu.PrefetchScalarGridSpec(
            num_scalar_prefetch=0,
            grid=(1,),                             # whole recurrence in one step
            in_specs=in_specs,
            out_specs=pl.BlockSpec((T * BP, OP), lambda i: (0, 0)),
            scratch_shapes=[pltpu.VMEM((T * BP, GP), jnp.float32),  # x*W_ih + b (all t)
                            pltpu.VMEM((T * BP, HP), jnp.float32)], # h_t buffer
        ),
        compiler_params=pltpu.CompilerParams(
            dimension_semantics=("arbitrary",)),
    )(*inputs)

    out = out_flat.reshape(T, BP, OP)[:, :B, :O]             # drop padding
    out = jnp.transpose(out, (1, 0, 2))                      # (B, T, O)
    if O == 1:
        out = out[..., 0]                                    # matches torch .squeeze(2)
    return out


def ref_forward(x, params, hidden_size, output_size):
    """Pure-JAX reference (dropout_frac = 0)."""
    w_ih, w_hh, b_ih, b_hh, w_out, b_out = params
    if x.ndim == 2:
        x = x[..., None]
    B, T, _ = x.shape
    H = hidden_size
    h = jnp.zeros((B, H), jnp.float32)
    c = jnp.zeros((B, H), jnp.float32)
    outs = []
    for t in range(T):
        xt = x[:, t, :]
        gates = xt @ w_ih.T + b_ih + h @ w_hh.T + b_hh
        i_g = jax.nn.sigmoid(gates[:, 0:H])
        f_g = jax.nn.sigmoid(gates[:, H:2 * H])
        g_g = jnp.tanh(gates[:, 2 * H:3 * H])
        o_g = jax.nn.sigmoid(gates[:, 3 * H:4 * H])
        c = f_g * c + i_g * g_g
        h = o_g * jnp.tanh(c)
        outs.append(h @ w_out.T + b_out)
    out = jnp.stack(outs, axis=1)                            # (B, T, O)
    if output_size == 1:
        out = out[..., 0]
    return out


if __name__ == "__main__":
    key = jax.random.PRNGKey(0)
    B, T = 2, 8
    input_size, hidden_size, output_size = 1, 32, 1

    k = 1.0 / np.sqrt(hidden_size)
    keys = jax.random.split(key, 7)
    w_ih = jax.random.uniform(keys[0], (4 * hidden_size, input_size), jnp.float32, -k, k)
    w_hh = jax.random.uniform(keys[1], (4 * hidden_size, hidden_size), jnp.float32, -k, k)
    b_ih = jax.random.uniform(keys[2], (4 * hidden_size,), jnp.float32, -k, k)
    b_hh = jax.random.uniform(keys[3], (4 * hidden_size,), jnp.float32, -k, k)
    w_out = jax.random.uniform(keys[4], (output_size, hidden_size), jnp.float32, -k, k)
    b_out = jax.random.uniform(keys[5], (output_size,), jnp.float32, -k, k)
    x = jax.random.normal(keys[6], (B, T), jnp.float32)

    params = (w_ih, w_hh, b_ih, b_hh, w_out, b_out)
    ref = ref_forward(x, params, hidden_size, output_size)

    # Exact f32-MXU path: must match the pure-JAX reference tightly.
    out_f32 = drnn_forward(x, params, hidden_size=hidden_size,
                           output_size=output_size, dropout_frac=0.0,
                           mxu_bf16=False)
    out_f32 = jax.block_until_ready(out_f32)
    np.testing.assert_allclose(np.asarray(out_f32), np.asarray(ref),
                               rtol=1e-5, atol=1e-5)

    # Default bf16-MXU-operand path: looser tolerance (bf16 operand rounding).
    out_bf16 = drnn_forward(x, params, hidden_size=hidden_size,
                            output_size=output_size, dropout_frac=0.0)
    out_bf16 = jax.block_until_ready(out_bf16)
    np.testing.assert_allclose(np.asarray(out_bf16), np.asarray(ref),
                               rtol=5e-2, atol=5e-2)

    # Dropout path smoke test (training semantics; RNG stream differs from torch).
    out_do = drnn_forward(x, params, hidden_size=hidden_size,
                          output_size=output_size, dropout_frac=0.5, seed=123)
    out_do = jax.block_until_ready(out_do)
    assert out_do.shape == out_f32.shape
    assert np.all(np.isfinite(np.asarray(out_do)))

    print("KERNEL_OK")
</pallas_src>

<mosaic_0001>
module attributes {stable_mosaic.version = 11 : i64} {
  func.func @_drnn_kernel(%arg0: i32, %arg1: memref<64x1xf32, #tpu.memory_space<vmem>>, %arg2: memref<1x512xf32, #tpu.memory_space<vmem>>, %arg3: memref<128x512xf32, #tpu.memory_space<vmem>>, %arg4: memref<1x512xf32, #tpu.memory_space<vmem>>, %arg5: memref<128x128xf32, #tpu.memory_space<vmem>>, %arg6: memref<1x128xf32, #tpu.memory_space<vmem>>, %arg7: memref<64x128xf32, #tpu.memory_space<vmem>>, %arg8: memref<64x512xf32, #tpu.memory_space<vmem>>, %arg9: memref<64x128xf32, #tpu.memory_space<vmem>>) attributes {dimension_semantics = [#tpu.dimension_semantics<arbitrary>], iteration_bounds = array<i64: 1>, scalar_prefetch = 0 : i64, scratch_operands = 2 : i64, tpu.core_type = #tpu.core_type<tc>, window_params = [{pipeline_mode = #tpu.pipeline_mode<synchronous>, transform_indices = @transform_0, window_bounds = array<i64: 64, 1>}, {pipeline_mode = #tpu.pipeline_mode<synchronous>, transform_indices = @transform_1, window_bounds = array<i64: 1, 512>}, {pipeline_mode = #tpu.pipeline_mode<synchronous>, transform_indices = @transform_2, window_bounds = array<i64: 128, 512>}, {pipeline_mode = #tpu.pipeline_mode<synchronous>, transform_indices = @transform_3, window_bounds = array<i64: 1, 512>}, {pipeline_mode = #tpu.pipeline_mode<synchronous>, transform_indices = @transform_4, window_bounds = array<i64: 128, 128>}, {pipeline_mode = #tpu.pipeline_mode<synchronous>, transform_indices = @transform_5, window_bounds = array<i64: 1, 128>}, {pipeline_mode = #tpu.pipeline_mode<synchronous>, transform_indices = @transform_6, window_bounds = array<i64: 64, 128>}]} {
    %c0 = arith.constant 0 : index
    %c0_0 = arith.constant 0 : index
    %0 = vector.load %arg1[%c0, %c0_0] : memref<64x1xf32, #tpu.memory_space<vmem>>, vector<64x1xf32>
    %c0_1 = arith.constant 0 : index
    %c0_2 = arith.constant 0 : index
    %1 = vector.load %arg2[%c0_1, %c0_2] : memref<1x512xf32, #tpu.memory_space<vmem>>, vector<1x512xf32>
    %2 = vector.broadcast %0 : vector<64x1xf32> to vector<64x512xf32>
    %3 = vector.broadcast %1 : vector<1x512xf32> to vector<64x512xf32>
    %4 = arith.mulf %2, %3 : vector<64x512xf32>
    %c0_3 = arith.constant 0 : index
    %c0_4 = arith.constant 0 : index
    %5 = vector.load %arg4[%c0_3, %c0_4] : memref<1x512xf32, #tpu.memory_space<vmem>>, vector<1x512xf32>
    %6 = vector.broadcast %5 : vector<1x512xf32> to vector<64x512xf32>
    %7 = arith.addf %4, %6 : vector<64x512xf32>
    %c0_5 = arith.constant 0 : index
    %c0_6 = arith.constant 0 : index
    %8 = vector.load %arg8[%c0_5, %c0_6] : memref<64x512xf32, #tpu.memory_space<vmem>>, vector<64x512xf32>
    tpu.vector_store %arg8[%c0_5, %c0_6], %7 {strides = array<i32>} : memref<64x512xf32, #tpu.memory_space<vmem>>, vector<64x512xf32>,
    %cst = arith.constant 0.000000e+00 : f32
    %9 = vector.broadcast %cst : f32 to vector<8x128xf32>
    %cst_7 = arith.constant 0.000000e+00 : f32
    %10 = vector.broadcast %cst_7 : f32 to vector<8x128xf32>
    %c0_8 = arith.constant 0 : index
    %c0_9 = arith.constant 0 : index
    %11 = vector.load %arg8[%c0_8, %c0_9] : memref<64x512xf32, #tpu.memory_space<vmem>>, vector<8x512xf32>
    %c0_10 = arith.constant 0 : index
    %c0_11 = arith.constant 0 : index
    %12 = vector.load %arg3[%c0_10, %c0_11] : memref<128x512xf32, #tpu.memory_space<vmem>>, vector<128x512xf32>
    %cst_12 = arith.constant dense<0.000000e+00> : vector<8x512xf32>
    %13 = tpu.matmul %9, %12, %cst_12 {dimension_numbers = #tpu.dot_dimension_numbers<[1], [0], [0], [1], [0, 0, 1, 1], [], []>} : vector<8x128xf32>, vector<128x512xf32>, vector<8x512xf32> -> vector<8x512xf32>
    %14 = arith.addf %11, %13 : vector<8x512xf32>
    %15 = vector.extract_strided_slice %14 {offsets = [0, 0], sizes = [8, 128], strides = [1, 1]} : vector<8x512xf32> to vector<8x128xf32>
    %16 = arith.negf %15 : vector<8x128xf32>
    %17 = math.exp %16 : vector<8x128xf32>
    %cst_13 = arith.constant 1.000000e+00 : f32
    %18 = vector.broadcast %cst_13 : f32 to vector<8x128xf32>
    %19 = arith.addf %18, %17 : vector<8x128xf32>
    %20 = arith.divf %18, %19 : vector<8x128xf32>
    %21 = vector.extract_strided_slice %14 {offsets = [0, 128], sizes = [8, 128], strides = [1, 1]} : vector<8x512xf32> to vector<8x128xf32>
    %22 = arith.negf %21 : vector<8x128xf32>
    %23 = math.exp %22 : vector<8x128xf32>
    %cst_14 = arith.constant 1.000000e+00 : f32
    %24 = vector.broadcast %cst_14 : f32 to vector<8x128xf32>
    %25 = arith.addf %24, %23 : vector<8x128xf32>
    %26 = arith.divf %24, %25 : vector<8x128xf32>
    %27 = vector.extract_strided_slice %14 {offsets = [0, 256], sizes = [8, 128], strides = [1, 1]} : vector<8x512xf32> to vector<8x128xf32>
    %28 = math.tanh %27 : vector<8x128xf32>
    %29 = vector.extract_strided_slice %14 {offsets = [0, 384], sizes = [8, 128], strides = [1, 1]} : vector<8x512xf32> to vector<8x128xf32>
    %30 = arith.negf %29 : vector<8x128xf32>
    %31 = math.exp %30 : vector<8x128xf32>
    %cst_15 = arith.constant 1.000000e+00 : f32
    %32 = vector.broadcast %cst_15 : f32 to vector<8x128xf32>
    %33 = arith.addf %32, %31 : vector<8x128xf32>
    %34 = arith.divf %32, %33 : vector<8x128xf32>
    %35 = arith.mulf %26, %10 : vector<8x128xf32>
    %36 = arith.mulf %20, %28 : vector<8x128xf32>
    %37 = arith.addf %35, %36 : vector<8x128xf32>
    %38 = math.tanh %37 : vector<8x128xf32>
    %39 = arith.mulf %34, %38 : vector<8x128xf32>
    %c0_16 = arith.constant 0 : index
    %c0_17 = arith.constant 0 : index
    %40 = vector.load %arg9[%c0_16, %c0_17] : memref<64x128xf32, #tpu.memory_space<vmem>>, vector<8x128xf32>
    tpu.vector_store %arg9[%c0_16, %c0_17], %39 {strides = array<i32>} : memref<64x128xf32, #tpu.memory_space<vmem>>, vector<8x128xf32>,
    %c8 = arith.constant 8 : index
    %c0_18 = arith.constant 0 : index
    %41 = vector.load %arg8[%c8, %c0_18] : memref<64x512xf32, #tpu.memory_space<vmem>>, vector<8x512xf32>
    %c0_19 = arith.constant 0 : index
    %c0_20 = arith.constant 0 : index
    %42 = vector.load %arg3[%c0_19, %c0_20] : memref<128x512xf32, #tpu.memory_space<vmem>>, vector<128x512xf32>
    %cst_21 = arith.constant dense<0.000000e+00> : vector<8x512xf32>
    %43 = tpu.matmul %39, %42, %cst_21 {dimension_numbers = #tpu.dot_dimension_numbers<[1], [0], [0], [1], [0, 0, 1, 1], [], []>} : vector<8x128xf32>, vector<128x512xf32>, vector<8x512xf32> -> vector<8x512xf32>
    %44 = arith.addf %41, %43 : vector<8x512xf32>
    %45 = vector.extract_strided_slice %44 {offsets = [0, 0], sizes = [8, 128], strides = [1, 1]} : vector<8x512xf32> to vector<8x128xf32>
    %46 = arith.negf %45 : vector<8x128xf32>
    %47 = math.exp %46 : vector<8x128xf32>
    %cst_22 = arith.constant 1.000000e+00 : f32
    %48 = vector.broadcast %cst_22 : f32 to vector<8x128xf32>
    %49 = arith.addf %48, %47 : vector<8x128xf32>
    %50 = arith.divf %48, %49 : vector<8x128xf32>
    %51 = vector.extract_strided_slice %44 {offsets = [0, 128], sizes = [8, 128], strides = [1, 1]} : vector<8x512xf32> to vector<8x128xf32>
    %52 = arith.negf %51 : vector<8x128xf32>
    %53 = math.exp %52 : vector<8x128xf32>
    %cst_23 = arith.constant 1.000000e+00 : f32
    %54 = vector.broadcast %cst_23 : f32 to vector<8x128xf32>
    %55 = arith.addf %54, %53 : vector<8x128xf32>
    %56 = arith.divf %54, %55 : vector<8x128xf32>
    %57 = vector.extract_strided_slice %44 {offsets = [0, 256], sizes = [8, 128], strides = [1, 1]} : vector<8x512xf32> to vector<8x128xf32>
    %58 = math.tanh %57 : vector<8x128xf32>
    %59 = vector.extract_strided_slice %44 {offsets = [0, 384], sizes = [8, 128], strides = [1, 1]} : vector<8x512xf32> to vector<8x128xf32>
    %60 = arith.negf %59 : vector<8x128xf32>
    %61 = math.exp %60 : vector<8x128xf32>
    %cst_24 = arith.constant 1.000000e+00 : f32
    %62 = vector.broadcast %cst_24 : f32 to vector<8x128xf32>
    %63 = arith.addf %62, %61 : vector<8x128xf32>
    %64 = arith.divf %62, %63 : vector<8x128xf32>
    %65 = arith.mulf %56, %37 : vector<8x128xf32>
    %66 = arith.mulf %50, %58 : vector<8x128xf32>
    %67 = arith.addf %65, %66 : vector<8x128xf32>
    %68 = math.tanh %67 : vector<8x128xf32>
    %69 = arith.mulf %64, %68 : vector<8x128xf32>
    %c8_25 = arith.constant 8 : index
    %c0_26 = arith.constant 0 : index
    %70 = vector.load %arg9[%c8_25, %c0_26] : memref<64x128xf32, #tpu.memory_space<vmem>>, vector<8x128xf32>
    tpu.vector_store %arg9[%c8_25, %c0_26], %69 {strides = array<i32>} : memref<64x128xf32, #tpu.memory_space<vmem>>, vector<8x128xf32>,
    %c16 = arith.constant 16 : index
    %c0_27 = arith.constant 0 : index
    %71 = vector.load %arg8[%c16, %c0_27] : memref<64x512xf32, #tpu.memory_space<vmem>>, vector<8x512xf32>
    %c0_28 = arith.constant 0 : index
    %c0_29 = arith.constant 0 : index
    %72 = vector.load %arg3[%c0_28, %c0_29] : memref<128x512xf32, #tpu.memory_space<vmem>>, vector<128x512xf32>
    %cst_30 = arith.constant dense<0.000000e+00> : vector<8x512xf32>
    %73 = tpu.matmul %69, %72, %cst_30 {dimension_numbers = #tpu.dot_dimension_numbers<[1], [0], [0], [1], [0, 0, 1, 1], [], []>} : vector<8x128xf32>, vector<128x512xf32>, vector<8x512xf32> -> vector<8x512xf32>
    %74 = arith.addf %71, %73 : vector<8x512xf32>
    %75 = vector.extract_strided_slice %74 {offsets = [0, 0], sizes = [8, 128], strides = [1, 1]} : vector<8x512xf32> to vector<8x128xf32>
    %76 = arith.negf %75 : vector<8x128xf32>
    %77 = math.exp %76 : vector<8x128xf32>
    %cst_31 = arith.constant 1.000000e+00 : f32
    %78 = vector.broadcast %cst_31 : f32 to vector<8x128xf32>
    %79 = arith.addf %78, %77 : vector<8x128xf32>
    %80 = arith.divf %78, %79 : vector<8x128xf32>
    %81 = vector.extract_strided_slice %74 {offsets = [0, 128], sizes = [8, 128], strides = [1, 1]} : vector<8x512xf32> to vector<8x128xf32>
    %82 = arith.negf %81 : vector<8x128xf32>
    %83 = math.exp %82 : vector<8x128xf32>
    %cst_32 = arith.constant 1.000000e+00 : f32
    %84 = vector.broadcast %cst_32 : f32 to vector<8x128xf32>
    %85 = arith.addf %84, %83 : vector<8x128xf32>
    %86 = arith.divf %84, %85 : vector<8x128xf32>
    %87 = vector.extract_strided_slice %74 {offsets = [0, 256], sizes = [8, 128], strides = [1, 1]} : vector<8x512xf32> to vector<8x128xf32>
    %88 = math.tanh %87 : vector<8x128xf32>
    %89 = vector.extract_strided_slice %74 {offsets = [0, 384], sizes = [8, 128], strides = [1, 1]} : vector<8x512xf32> to vector<8x128xf32>
    %90 = arith.negf %89 : vector<8x128xf32>
    %91 = math.exp %90 : vector<8x128xf32>
    %cst_33 = arith.constant 1.000000e+00 : f32
    %92 = vector.broadcast %cst_33 : f32 to vector<8x128xf32>
    %93 = arith.addf %92, %91 : vector<8x128xf32>
    %94 = arith.divf %92, %93 : vector<8x128xf32>
    %95 = arith.mulf %86, %67 : vector<8x128xf32>
    %96 = arith.mulf %80, %88 : vector<8x128xf32>
    %97 = arith.addf %95, %96 : vector<8x128xf32>
    %98 = math.tanh %97 : vector<8x128xf32>
    %99 = arith.mulf %94, %98 : vector<8x128xf32>
    %c16_34 = arith.constant 16 : index
    %c0_35 = arith.constant 0 : index
    %100 = vector.load %arg9[%c16_34, %c0_35] : memref<64x128xf32, #tpu.memory_space<vmem>>, vector<8x128xf32>
    tpu.vector_store %arg9[%c16_34, %c0_35], %99 {strides = array<i32>} : memref<64x128xf32, #tpu.memory_space<vmem>>, vector<8x128xf32>,
    %c24 = arith.constant 24 : index
    %c0_36 = arith.constant 0 : index
    %101 = vector.load %arg8[%c24, %c0_36] : memref<64x512xf32, #tpu.memory_space<vmem>>, vector<8x512xf32>
    %c0_37 = arith.constant 0 : index
    %c0_38 = arith.constant 0 : index
    %102 = vector.load %arg3[%c0_37, %c0_38] : memref<128x512xf32, #tpu.memory_space<vmem>>, vector<128x512xf32>
    %cst_39 = arith.constant dense<0.000000e+00> : vector<8x512xf32>
    %103 = tpu.matmul %99, %102, %cst_39 {dimension_numbers = #tpu.dot_dimension_numbers<[1], [0], [0], [1], [0, 0, 1, 1], [], []>} : vector<8x128xf32>, vector<128x512xf32>, vector<8x512xf32> -> vector<8x512xf32>
    %104 = arith.addf %101, %103 : vector<8x512xf32>
    %105 = vector.extract_strided_slice %104 {offsets = [0, 0], sizes = [8, 128], strides = [1, 1]} : vector<8x512xf32> to vector<8x128xf32>
    %106 = arith.negf %105 : vector<8x128xf32>
    %107 = math.exp %106 : vector<8x128xf32>
    %cst_40 = arith.constant 1.000000e+00 : f32
    %108 = vector.broadcast %cst_40 : f32 to vector<8x128xf32>
    %109 = arith.addf %108, %107 : vector<8x128xf32>
    %110 = arith.divf %108, %109 : vector<8x128xf32>
    %111 = vector.extract_strided_slice %104 {offsets = [0, 128], sizes = [8, 128], strides = [1, 1]} : vector<8x512xf32> to vector<8x128xf32>
    %112 = arith.negf %111 : vector<8x128xf32>
    %113 = math.exp %112 : vector<8x128xf32>
    %cst_41 = arith.constant 1.000000e+00 : f32
    %114 = vector.broadcast %cst_41 : f32 to vector<8x128xf32>
    %115 = arith.addf %114, %113 : vector<8x128xf32>
    %116 = arith.divf %114, %115 : vector<8x128xf32>
    %117 = vector.extract_strided_slice %104 {offsets = [0, 256], sizes = [8, 128], strides = [1, 1]} : vector<8x512xf32> to vector<8x128xf32>
    %118 = math.tanh %117 : vector<8x128xf32>
    %119 = vector.extract_strided_slice %104 {offsets = [0, 384], sizes = [8, 128], strides = [1, 1]} : vector<8x512xf32> to vector<8x128xf32>
    %120 = arith.negf %119 : vector<8x128xf32>
    %121 = math.exp %120 : vector<8x128xf32>
    %cst_42 = arith.constant 1.000000e+00 : f32
    %122 = vector.broadcast %cst_42 : f32 to vector<8x128xf32>
    %123 = arith.addf %122, %121 : vector<8x128xf32>
    %124 = arith.divf %122, %123 : vector<8x128xf32>
    %125 = arith.mulf %116, %97 : vector<8x128xf32>
    %126 = arith.mulf %110, %118 : vector<8x128xf32>
    %127 = arith.addf %125, %126 : vector<8x128xf32>
    %128 = math.tanh %127 : vector<8x128xf32>
    %129 = arith.mulf %124, %128 : vector<8x128xf32>
    %c24_43 = arith.constant 24 : index
    %c0_44 = arith.constant 0 : index
    %130 = vector.load %arg9[%c24_43, %c0_44] : memref<64x128xf32, #tpu.memory_space<vmem>>, vector<8x128xf32>
    tpu.vector_store %arg9[%c24_43, %c0_44], %129 {strides = array<i32>} : memref<64x128xf32, #tpu.memory_space<vmem>>, vector<8x128xf32>,
    %c32 = arith.constant 32 : index
    %c0_45 = arith.constant 0 : index
    %131 = vector.load %arg8[%c32, %c0_45] : memref<64x512xf32, #tpu.memory_space<vmem>>, vector<8x512xf32>
    %c0_46 = arith.constant 0 : index
    %c0_47 = arith.constant 0 : index
    %132 = vector.load %arg3[%c0_46, %c0_47] : memref<128x512xf32, #tpu.memory_space<vmem>>, vector<128x512xf32>
    %cst_48 = arith.constant dense<0.000000e+00> : vector<8x512xf32>
    %133 = tpu.matmul %129, %132, %cst_48 {dimension_numbers = #tpu.dot_dimension_numbers<[1], [0], [0], [1], [0, 0, 1, 1], [], []>} : vector<8x128xf32>, vector<128x512xf32>, vector<8x512xf32> -> vector<8x512xf32>
    %134 = arith.addf %131, %133 : vector<8x512xf32>
    %135 = vector.extract_strided_slice %134 {offsets = [0, 0], sizes = [8, 128], strides = [1, 1]} : vector<8x512xf32> to vector<8x128xf32>
    %136 = arith.negf %135 : vector<8x128xf32>
    %137 = math.exp %136 : vector<8x128xf32>
    %cst_49 = arith.constant 1.000000e+00 : f32
    %138 = vector.broadcast %cst_49 : f32 to vector<8x128xf32>
    %139 = arith.addf %138, %137 : vector<8x128xf32>
    %140 = arith.divf %138, %139 : vector<8x128xf32>
    %141 = vector.extract_strided_slice %134 {offsets = [0, 128], sizes = [8, 128], strides = [1, 1]} : vector<8x512xf32> to vector<8x128xf32>
    %142 = arith.negf %141 : vector<8x128xf32>
    %143 = math.exp %142 : vector<8x128xf32>
    %cst_50 = arith.constant 1.000000e+00 : f32
    %144 = vector.broadcast %cst_50 : f32 to vector<8x128xf32>
    %145 = arith.addf %144, %143 : vector<8x128xf32>
    %146 = arith.divf %144, %145 : vector<8x128xf32>
    %147 = vector.extract_strided_slice %134 {offsets = [0, 256], sizes = [8, 128], strides = [1, 1]} : vector<8x512xf32> to vector<8x128xf32>
    %148 = math.tanh %147 : vector<8x128xf32>
    %149 = vector.extract_strided_slice %134 {offsets = [0, 384], sizes = [8, 128], strides = [1, 1]} : vector<8x512xf32> to vector<8x128xf32>
    %150 = arith.negf %149 : vector<8x128xf32>
    %151 = math.exp %150 : vector<8x128xf32>
    %cst_51 = arith.constant 1.000000e+00 : f32
    %152 = vector.broadcast %cst_51 : f32 to vector<8x128xf32>
    %153 = arith.addf %152, %151 : vector<8x128xf32>
    %154 = arith.divf %152, %153 : vector<8x128xf32>
    %155 = arith.mulf %146, %127 : vector<8x128xf32>
    %156 = arith.mulf %140, %148 : vector<8x128xf32>
    %157 = arith.addf %155, %156 : vector<8x128xf32>
    %158 = math.tanh %157 : vector<8x128xf32>
    %159 = arith.mulf %154, %158 : vector<8x128xf32>
    %c32_52 = arith.constant 32 : index
    %c0_53 = arith.constant 0 : index
    %160 = vector.load %arg9[%c32_52, %c0_53] : memref<64x128xf32, #tpu.memory_space<vmem>>, vector<8x128xf32>
    tpu.vector_store %arg9[%c32_52, %c0_53], %159 {strides = array<i32>} : memref<64x128xf32, #tpu.memory_space<vmem>>, vector<8x128xf32>,
    %c40 = arith.constant 40 : index
    %c0_54 = arith.constant 0 : index
    %161 = vector.load %arg8[%c40, %c0_54] : memref<64x512xf32, #tpu.memory_space<vmem>>, vector<8x512xf32>
    %c0_55 = arith.constant 0 : index
    %c0_56 = arith.constant 0 : index
    %162 = vector.load %arg3[%c0_55, %c0_56] : memref<128x512xf32, #tpu.memory_space<vmem>>, vector<128x512xf32>
    %cst_57 = arith.constant dense<0.000000e+00> : vector<8x512xf32>
    %163 = tpu.matmul %159, %162, %cst_57 {dimension_numbers = #tpu.dot_dimension_numbers<[1], [0], [0], [1], [0, 0, 1, 1], [], []>} : vector<8x128xf32>, vector<128x512xf32>, vector<8x512xf32> -> vector<8x512xf32>
    %164 = arith.addf %161, %163 : vector<8x512xf32>
    %165 = vector.extract_strided_slice %164 {offsets = [0, 0], sizes = [8, 128], strides = [1, 1]} : vector<8x512xf32> to vector<8x128xf32>
    %166 = arith.negf %165 : vector<8x128xf32>
    %167 = math.exp %166 : vector<8x128xf32>
    %cst_58 = arith.constant 1.000000e+00 : f32
    %168 = vector.broadcast %cst_58 : f32 to vector<8x128xf32>
    %169 = arith.addf %168, %167 : vector<8x128xf32>
    %170 = arith.divf %168, %169 : vector<8x128xf32>
    %171 = vector.extract_strided_slice %164 {offsets = [0, 128], sizes = [8, 128], strides = [1, 1]} : vector<8x512xf32> to vector<8x128xf32>
    %172 = arith.negf %171 : vector<8x128xf32>
    %173 = math.exp %172 : vector<8x128xf32>
    %cst_59 = arith.constant 1.000000e+00 : f32
    %174 = vector.broadcast %cst_59 : f32 to vector<8x128xf32>
    %175 = arith.addf %174, %173 : vector<8x128xf32>
    %176 = arith.divf %174, %175 : vector<8x128xf32>
    %177 = vector.extract_strided_slice %164 {offsets = [0, 256], sizes = [8, 128], strides = [1, 1]} : vector<8x512xf32> to vector<8x128xf32>
    %178 = math.tanh %177 : vector<8x128xf32>
    %179 = vector.extract_strided_slice %164 {offsets = [0, 384], sizes = [8, 128], strides = [1, 1]} : vector<8x512xf32> to vector<8x128xf32>
    %180 = arith.negf %179 : vector<8x128xf32>
    %181 = math.exp %180 : vector<8x128xf32>
    %cst_60 = arith.constant 1.000000e+00 : f32
    %182 = vector.broadcast %cst_60 : f32 to vector<8x128xf32>
    %183 = arith.addf %182, %181 : vector<8x128xf32>
    %184 = arith.divf %182, %183 : vector<8x128xf32>
    %185 = arith.mulf %176, %157 : vector<8x128xf32>
    %186 = arith.mulf %170, %178 : vector<8x128xf32>
    %187 = arith.addf %185, %186 : vector<8x128xf32>
    %188 = math.tanh %187 : vector<8x128xf32>
    %189 = arith.mulf %184, %188 : vector<8x128xf32>
    %c40_61 = arith.constant 40 : index
    %c0_62 = arith.constant 0 : index
    %190 = vector.load %arg9[%c40_61, %c0_62] : memref<64x128xf32, #tpu.memory_space<vmem>>, vector<8x128xf32>
    tpu.vector_store %arg9[%c40_61, %c0_62], %189 {strides = array<i32>} : memref<64x128xf32, #tpu.memory_space<vmem>>, vector<8x128xf32>,
    %c48 = arith.constant 48 : index
    %c0_63 = arith.constant 0 : index
    %191 = vector.load %arg8[%c48, %c0_63] : memref<64x512xf32, #tpu.memory_space<vmem>>, vector<8x512xf32>
    %c0_64 = arith.constant 0 : index
    %c0_65 = arith.constant 0 : index
    %192 = vector.load %arg3[%c0_64, %c0_65] : memref<128x512xf32, #tpu.memory_space<vmem>>, vector<128x512xf32>
    %cst_66 = arith.constant dense<0.000000e+00> : vector<8x512xf32>
    %193 = tpu.matmul %189, %192, %cst_66 {dimension_numbers = #tpu.dot_dimension_numbers<[1], [0], [0], [1], [0, 0, 1, 1], [], []>} : vector<8x128xf32>, vector<128x512xf32>, vector<8x512xf32> -> vector<8x512xf32>
    %194 = arith.addf %191, %193 : vector<8x512xf32>
    %195 = vector.extract_strided_slice %194 {offsets = [0, 0], sizes = [8, 128], strides = [1, 1]} : vector<8x512xf32> to vector<8x128xf32>
    %196 = arith.negf %195 : vector<8x128xf32>
    %197 = math.exp %196 : vector<8x128xf32>
    %cst_67 = arith.constant 1.000000e+00 : f32
    %198 = vector.broadcast %cst_67 : f32 to vector<8x128xf32>
    %199 = arith.addf %198, %197 : vector<8x128xf32>
    %200 = arith.divf %198, %199 : vector<8x128xf32>
    %201 = vector.extract_strided_slice %194 {offsets = [0, 128], sizes = [8, 128], strides = [1, 1]} : vector<8x512xf32> to vector<8x128xf32>
    %202 = arith.negf %201 : vector<8x128xf32>
    %203 = math.exp %202 : vector<8x128xf32>
    %cst_68 = arith.constant 1.000000e+00 : f32
    %204 = vector.broadcast %cst_68 : f32 to vector<8x128xf32>
    %205 = arith.addf %204, %203 : vector<8x128xf32>
    %206 = arith.divf %204, %205 : vector<8x128xf32>
    %207 = vector.extract_strided_slice %194 {offsets = [0, 256], sizes = [8, 128], strides = [1, 1]} : vector<8x512xf32> to vector<8x128xf32>
    %208 = math.tanh %207 : vector<8x128xf32>
    %209 = vector.extract_strided_slice %194 {offsets = [0, 384], sizes = [8, 128], strides = [1, 1]} : vector<8x512xf32> to vector<8x128xf32>
    %210 = arith.negf %209 : vector<8x128xf32>
    %211 = math.exp %210 : vector<8x128xf32>
    %cst_69 = arith.constant 1.000000e+00 : f32
    %212 = vector.broadcast %cst_69 : f32 to vector<8x128xf32>
    %213 = arith.addf %212, %211 : vector<8x128xf32>
    %214 = arith.divf %212, %213 : vector<8x128xf32>
    %215 = arith.mulf %206, %187 : vector<8x128xf32>
    %216 = arith.mulf %200, %208 : vector<8x128xf32>
    %217 = arith.addf %215, %216 : vector<8x128xf32>
    %218 = math.tanh %217 : vector<8x128xf32>
    %219 = arith.mulf %214, %218 : vector<8x128xf32>
    %c48_70 = arith.constant 48 : index
    %c0_71 = arith.constant 0 : index
    %220 = vector.load %arg9[%c48_70, %c0_71] : memref<64x128xf32, #tpu.memory_space<vmem>>, vector<8x128xf32>
    tpu.vector_store %arg9[%c48_70, %c0_71], %219 {strides = array<i32>} : memref<64x128xf32, #tpu.memory_space<vmem>>, vector<8x128xf32>,
    %c56 = arith.constant 56 : index
    %c0_72 = arith.constant 0 : index
    %221 = vector.load %arg8[%c56, %c0_72] : memref<64x512xf32, #tpu.memory_space<vmem>>, vector<8x512xf32>
    %c0_73 = arith.constant 0 : index
    %c0_74 = arith.constant 0 : index
    %222 = vector.load %arg3[%c0_73, %c0_74] : memref<128x512xf32, #tpu.memory_space<vmem>>, vector<128x512xf32>
    %cst_75 = arith.constant dense<0.000000e+00> : vector<8x512xf32>
    %223 = tpu.matmul %219, %222, %cst_75 {dimension_numbers = #tpu.dot_dimension_numbers<[1], [0], [0], [1], [0, 0, 1, 1], [], []>} : vector<8x128xf32>, vector<128x512xf32>, vector<8x512xf32> -> vector<8x512xf32>
    %224 = arith.addf %221, %223 : vector<8x512xf32>
    %225 = vector.extract_strided_slice %224 {offsets = [0, 0], sizes = [8, 128], strides = [1, 1]} : vector<8x512xf32> to vector<8x128xf32>
    %226 = arith.negf %225 : vector<8x128xf32>
    %227 = math.exp %226 : vector<8x128xf32>
    %cst_76 = arith.constant 1.000000e+00 : f32
    %228 = vector.broadcast %cst_76 : f32 to vector<8x128xf32>
    %229 = arith.addf %228, %227 : vector<8x128xf32>
    %230 = arith.divf %228, %229 : vector<8x128xf32>
    %231 = vector.extract_strided_slice %224 {offsets = [0, 128], sizes = [8, 128], strides = [1, 1]} : vector<8x512xf32> to vector<8x128xf32>
    %232 = arith.negf %231 : vector<8x128xf32>
    %233 = math.exp %232 : vector<8x128xf32>
    %cst_77 = arith.constant 1.000000e+00 : f32
    %234 = vector.broadcast %cst_77 : f32 to vector<8x128xf32>
    %235 = arith.addf %234, %233 : vector<8x128xf32>
    %236 = arith.divf %234, %235 : vector<8x128xf32>
    %237 = vector.extract_strided_slice %224 {offsets = [0, 256], sizes = [8, 128], strides = [1, 1]} : vector<8x512xf32> to vector<8x128xf32>
    %238 = math.tanh %237 : vector<8x128xf32>
    %239 = vector.extract_strided_slice %224 {offsets = [0, 384], sizes = [8, 128], strides = [1, 1]} : vector<8x512xf32> to vector<8x128xf32>
    %240 = arith.negf %239 : vector<8x128xf32>
    %241 = math.exp %240 : vector<8x128xf32>
    %cst_78 = arith.constant 1.000000e+00 : f32
    %242 = vector.broadcast %cst_78 : f32 to vector<8x128xf32>
    %243 = arith.addf %242, %241 : vector<8x128xf32>
    %244 = arith.divf %242, %243 : vector<8x128xf32>
    %245 = arith.mulf %236, %217 : vector<8x128xf32>
    %246 = arith.mulf %230, %238 : vector<8x128xf32>
    %247 = arith.addf %245, %246 : vector<8x128xf32>
    %248 = math.tanh %247 : vector<8x128xf32>
    %249 = arith.mulf %244, %248 : vector<8x128xf32>
    %c56_79 = arith.constant 56 : index
    %c0_80 = arith.constant 0 : index
    %250 = vector.load %arg9[%c56_79, %c0_80] : memref<64x128xf32, #tpu.memory_space<vmem>>, vector<8x128xf32>
    tpu.vector_store %arg9[%c56_79, %c0_80], %249 {strides = array<i32>} : memref<64x128xf32, #tpu.memory_space<vmem>>, vector<8x128xf32>,
    %c0_81 = arith.constant 0 : index
    %c0_82 = arith.constant 0 : index
    %251 = vector.load %arg9[%c0_81, %c0_82] : memref<64x128xf32, #tpu.memory_space<vmem>>, vector<64x128xf32>
    %c0_83 = arith.constant 0 : index
    %c0_84 = arith.constant 0 : index
    %252 = vector.load %arg5[%c0_83, %c0_84] : memref<128x128xf32, #tpu.memory_space<vmem>>, vector<128x128xf32>
    %cst_85 = arith.constant dense<0.000000e+00> : vector<64x128xf32>
    %253 = tpu.matmul %251, %252, %cst_85 {dimension_numbers = #tpu.dot_dimension_numbers<[1], [0], [0], [1], [0, 0, 1, 1], [], []>} : vector<64x128xf32>, vector<128x128xf32>, vector<64x128xf32> -> vector<64x128xf32>
    %c0_86 = arith.constant 0 : index
    %c0_87 = arith.constant 0 : index
    %254 = vector.load %arg6[%c0_86, %c0_87] : memref<1x128xf32, #tpu.memory_space<vmem>>, vector<1x128xf32>
    %255 = vector.broadcast %254 : vector<1x128xf32> to vector<64x128xf32>
    %256 = arith.addf %253, %255 : vector<64x128xf32>
    %c0_88 = arith.constant 0 : index
    %c0_89 = arith.constant 0 : index
    %257 = vector.load %arg7[%c0_88, %c0_89] : memref<64x128xf32, #tpu.memory_space<vmem>>, vector<64x128xf32>
    tpu.vector_store %arg7[%c0_88, %c0_89], %256 {strides = array<i32>} : memref<64x128xf32, #tpu.memory_space<vmem>>, vector<64x128xf32>,
    return
  }
  func.func @transform_0(%arg0: i32) -> (i32, i32) {
    %c0_i32 = arith.constant 0 : i32
    %c0_i32_0 = arith.constant 0 : i32
    %c0_i32_1 = arith.constant 0 : i32
    return %c0_i32, %c0_i32_0 : i32, i32
  }
  func.func @transform_1(%arg0: i32) -> (i32, i32) {
    %c0_i32 = arith.constant 0 : i32
    %c0_i32_0 = arith.constant 0 : i32
    %c0_i32_1 = arith.constant 0 : i32
    return %c0_i32, %c0_i32_0 : i32, i32
  }
  func.func @transform_2(%arg0: i32) -> (i32, i32) {
    %c0_i32 = arith.constant 0 : i32
    %c0_i32_0 = arith.constant 0 : i32
    %c0_i32_1 = arith.constant 0 : i32
    return %c0_i32, %c0_i32_0 : i32, i32
  }
  func.func @transform_3(%arg0: i32) -> (i32, i32) {
    %c0_i32 = arith.constant 0 : i32
    %c0_i32_0 = arith.constant 0 : i32
    %c0_i32_1 = arith.constant 0 : i32
    return %c0_i32, %c0_i32_0 : i32, i32
  }
  func.func @transform_4(%arg0: i32) -> (i32, i32) {
    %c0_i32 = arith.constant 0 : i32
    %c0_i32_0 = arith.constant 0 : i32
    %c0_i32_1 = arith.constant 0 : i32
    return %c0_i32, %c0_i32_0 : i32, i32
  }
  func.func @transform_5(%arg0: i32) -> (i32, i32) {
    %c0_i32 = arith.constant 0 : i32
    %c0_i32_0 = arith.constant 0 : i32
    %c0_i32_1 = arith.constant 0 : i32
    return %c0_i32, %c0_i32_0 : i32, i32
  }
  func.func @transform_6(%arg0: i32) -> (i32, i32) {
    %c0_i32 = arith.constant 0 : i32
    %c0_i32_0 = arith.constant 0 : i32
    %c0_i32_1 = arith.constant 0 : i32
    return %c0_i32, %c0_i32_0 : i32, i32
  }
}

</mosaic_0001>

<bundles_post_ra>
// kernel: tpu_custom_call.1
= control target key start
LH: loop header
LB: loop body
LE: loop exit
PB: predicated region body
PF: predicated region fallthrough
CT: control target
= control target key end

     0   :  { %11 = vsyncpa [#allocation5], 0  ;;  %s3796_s0 = inlined_call_operand.vmem [shape: f32[64,1], index: 0, kind: input, shape index: {}]   ;;  %s3797_s1 = inlined_call_operand.vmem [shape: f32[1,512], index: 1, kind: input, shape index: {}]   ;;  %s3798_s2 = inlined_call_operand.hbm [shape: f32[128,512], index: 2, kind: input, shape index: {}]   ;;  %s3799_s3 = inlined_call_operand.vmem [shape: f32[1,512], index: 3, kind: input, shape index: {}]   ;;  %s3800_s4 = inlined_call_operand.hbm [shape: f32[128,128], index: 4, kind: input, shape index: {}]   ;;  %s3801_s5 = inlined_call_operand.vmem [shape: f32[1,128], index: 5, kind: input, shape index: {}]   ;;  %s3802_s6 = inlined_call_operand.hbm [shape: f32[64,128], index: 6, kind: output, shape index: {}]  }
   0x1   :  { %12 = vsyncpa [#allocation8], 0 }
   0x2   :  { %13 = vsyncpa [#allocation6], 0  ;;  %s3162_s21 = smov [#allocation4]   ;;  %s3090_s25 = scalar_lea.hbm %s3798_s2, 8192 }
   0x3   :  { %s23_s22 = sshll.u32 %s3162_s21, 4  ;;  %p3091_p0 = scmp.ne.s32.totalorder %s3798_s2, %s3090_s25  ;;  %s24_s22 = int_to_ptr.vmem [resolvable:$true] %s23_s22 }
   0x4   :  { %p3094_p1 = scmp.lt.u32.totalorder %s3090_s25, %s3798_s2 }
   0x6   :  { %p3096_p2 = pnand %p3094_p1, %p3091_p0 }
   0x8   :  { %3099 = shalt.err (!%p3096_p2)
}
   0x9   :  { %s3100_s30 = scalar_lea.vmem %s24_s22, 8192  ;;  %p3105_p4 = scmp.lt.s32.totalorder %s24_s22, %s24_s22 }
   0xa   :  { %p3101_p3 = scmp.ne.s32.totalorder %s24_s22, %s3100_s30  ;;  %p3106_p5 = scmp.lt.s32.totalorder %s3100_s30, %s3100_s30 }
   0xc   :  { %p3107_p6 = por %p3106_p5, %p3105_p4 }
   0xe   :  { %p3108_p7 = pnand %p3107_p6, %p3101_p3 }
  0x10   :  { %3111 = shalt.err (!%p3108_p7)
}
  0x11   :  { %s3163_s7 = smov 512   ;;  %s3164_s8 = smov 32  }
  0x12   :  { %29 = dma.hbm_to_vmem [thread:$0]  %s3798_s2, 8192, %s24_s22, [#allocation5], %s3163_s7, %s3163_s7, %s3164_s8  }
  0x13   :  { %s3165_s11 = smov [#allocation7]   ;;  %s3112_s15 = scalar_lea.hbm %s3800_s4, 2048 }
  0x14   :  { %s37_s12 = sshll.u32 %s3165_s11, 4  ;;  %p3113_p8 = scmp.ne.s32.totalorder %s3800_s4, %s3112_s15  ;;  %s38_s12 = int_to_ptr.vmem [resolvable:$true] %s37_s12 }
  0x15   :  { %p3116_p9 = scmp.lt.u32.totalorder %s3112_s15, %s3800_s4 }
  0x17   :  { %p3118_p10 = pnand %p3116_p9, %p3113_p8 }
  0x19   :  { %3121 = shalt.err (!%p3118_p10)
}
  0x1a   :  { %s3122_s20 = scalar_lea.vmem %s38_s12, 2048  ;;  %p3127_p12 = scmp.lt.s32.totalorder %s38_s12, %s38_s12 }
  0x1b   :  { %p3123_p11 = scmp.ne.s32.totalorder %s38_s12, %s3122_s20  ;;  %p3128_p13 = scmp.lt.s32.totalorder %s3122_s20, %s3122_s20 }
  0x1d   :  { %p3129_p0 = por %p3128_p13, %p3127_p12 }
  0x1f   :  { %p3130_p1 = pnand %p3129_p0, %p3123_p11 }
  0x21   :  { %3133 = shalt.err (!%p3130_p1)
}
  0x22   :  { %s3166_s2 = smov 128   ;;  %s3167_s21 = smov 8  }
  0x23   :  { %43 = dma.hbm_to_vmem [thread:$0]  %s3800_s4, 2048, %s38_s12, [#allocation8], %s3166_s2, %s3166_s2, %s3167_s21  }
  0x24   :  { %3156 = dma.done.wait [#allocation5], 8192  }
  0x25   :  { %3157 = vsyncadd [#allocation5], 4294959104 }
  0x26   :  { %3158 = dma.done.wait [#allocation8], 2048  }
  0x27   :  { %3159 = vsyncadd [#allocation8], 4294965248  ;;  %v3168_v0 = vmov 0.0   ;;  %v3169_v1 = vmov 0   ;;  %v245_v2 = vld [vmem:[#allocation4 + $0x8] sm:$0xff]  ;;  %v244_v4 = vld [vmem:[#allocation4] sm:$0xff] }
  0x28   :  { %372 = vmatprep.mubr.f32.mxu1 %v3168_v0  ;;  %2960 = vset.pattern.permute.xlu0 %v3169_v1  ;;  %v249_v3 = vld [vmem:[#allocation4 + $0x28] sm:$0xff]  ;;  %v248_v6 = vld [vmem:[#allocation4 + $0x20] sm:$0xff]  ;;  %v247_v51 = vld [vmem:[#allocation4 + $0x18] sm:$0xff] }
  0x29   :  { %611 = vmatprep.mubr.f32.mxu0 %v3168_v0  ;;  %2961 = vset.pattern.permute.xlu1 %v3169_v1  ;;  %v3235_v5 = vpack.c.bf16 %v249_v3, %v245_v2  ;;  %v253_v7 = vld [vmem:[#allocation4 + $0x48] sm:$0xff]  ;;  %v3237_v9 = vpack.c.bf16 %v248_v6, %v244_v4  ;;  %v252_v11 = vld [vmem:[#allocation4 + $0x40] sm:$0xff]  ;;  %v251_v52 = vld [vmem:[#allocation4 + $0x38] sm:$0xff] }
  0x2a   :  { %v257_v8 = vld [vmem:[#allocation4 + $0x68] sm:$0xff]  ;;  %v256_v12 = vld [vmem:[#allocation4 + $0x60] sm:$0xff]  ;;  %v3305_v55 = vpack.c.bf16 %v251_v52, %v247_v51  ;;  %v246_v56 = vld [vmem:[#allocation4 + $0x10] sm:$0xff] }
  0x2b   :  { %v3239_v10 = vpack.c.bf16 %v257_v8, %v253_v7  ;;  %v261_v13 = vld [vmem:[#allocation4 + $0x88] sm:$0xff]  ;;  %2408 = vmatprep.subr.bf16.mxu1 %v3235_v5  ;;  %2472 = vmatprep.subr.bf16.mxu0 %v3235_v5  ;;  %v3244_v15 = vpack.c.bf16 %v256_v12, %v252_v11  ;;  %v260_v17 = vld [vmem:[#allocation4 + $0x80] sm:$0xff]  ;;  %v250_v57 = vld [vmem:[#allocation4 + $0x30] sm:$0xff] }
  0x2c   :  { %v265_v14 = vld [vmem:[#allocation4 + $0xa8] sm:$0xff]  ;;  %2410 = vmatpush1.bf16.msra.mxu1 %v3237_v9  ;;  %2474 = vmatpush1.bf16.msra.mxu0 %v3237_v9  ;;  %v264_v18 = vld [vmem:[#allocation4 + $0xa0] sm:$0xff]  ;;  %v255_v58 = vld [vmem:[#allocation4 + $0x58] sm:$0xff]  ;;  %v3312_v61 = vpack.c.bf16 %v250_v57, %v246_v56 }
  0x2d   :  { %2412 = vmatprep.subr.bf16.mxu1 %v3239_v10  ;;  %v3248_v16 = vpack.c.bf16 %v265_v14, %v261_v13  ;;  %2476 = vmatprep.subr.bf16.mxu0 %v3239_v10  ;;  %v269_v19 = vld [vmem:[#allocation4 + $0xc8] sm:$0xff]  ;;  %v3252_v21 = vpack.c.bf16 %v264_v18, %v260_v17  ;;  %v268_v23 = vld [vmem:[#allocation4 + $0xc0] sm:$0xff]  ;;  %v259_v59 = vld [vmem:[#allocation4 + $0x78] sm:$0xff] }
  0x2e   :  { %v273_v20 = vld [vmem:[#allocation4 + $0xe8] sm:$0xff]  ;;  %v272_v24 = vld [vmem:[#allocation4 + $0xe0] sm:$0xff]  ;;  %v58_v60 = vld [vmem:[%s3796_s0 + $0x30] sm:$0xff]  ;;  %v3316_v62 = vpack.c.bf16 %v259_v59, %v255_v58 }
  0x2f   :  { %v3256_v22 = vpack.c.bf16 %v273_v20, %v269_v19  ;;  %v277_v25 = vld [vmem:[#allocation4 + $0x108] sm:$0xff]  ;;  %v3260_v27 = vpack.c.bf16 %v272_v24, %v268_v23  ;;  %v276_v29 = vld [vmem:[#allocation4 + $0x100] sm:$0xff]  ;;  %v254_v63 = vld [vmem:[#allocation4 + $0x50] sm:$0xff] }
  0x30   :  { %2414 = vmatpush1.bf16.msra.mxu1 %v3244_v15  ;;  %2478 = vmatpush1.bf16.msra.mxu0 %v3244_v15  ;;  %v281_v26 = vld [vmem:[#allocation4 + $0x128] sm:$0xff]  ;;  %v280_v30 = vld [vmem:[#allocation4 + $0x120] sm:$0xff]  ;;  %v258_v1 = vld [vmem:[#allocation4 + $0x70] sm:$0xff] }
  0x31   :  { %2416 = vmatprep.subr.bf16.mxu1 %v3248_v16  ;;  %2480 = vmatprep.subr.bf16.mxu0 %v3248_v16  ;;  %v3264_v28 = vpack.c.bf16 %v281_v26, %v277_v25  ;;  %v285_v31 = vld [vmem:[#allocation4 + $0x148] sm:$0xff]  ;;  %v3268_v33 = vpack.c.bf16 %v280_v30, %v276_v29  ;;  %v284_v35 = vld [vmem:[#allocation4 + $0x140] sm:$0xff]  ;;  %v263_v2 = vld [vmem:[#allocation4 + $0x98] sm:$0xff]  ;;  %v3321_v4 = vpack.c.bf16 %v258_v1, %v254_v63 }
  0x32   :  { %v289_v32 = vld [vmem:[#allocation4 + $0x168] sm:$0xff]  ;;  %v288_v36 = vld [vmem:[#allocation4 + $0x160] sm:$0xff]  ;;  %v267_v3 = vld [vmem:[#allocation4 + $0xb8] sm:$0xff] }
  0x33   :  { %v3272_v34 = vpack.c.bf16 %v289_v32, %v285_v31  ;;  %v293_v37 = vld [vmem:[#allocation4 + $0x188] sm:$0xff]  ;;  %v3276_v39 = vpack.c.bf16 %v288_v36, %v284_v35  ;;  %v292_v41 = vld [vmem:[#allocation4 + $0x180] sm:$0xff]  ;;  %v3325_v6 = vpack.c.bf16 %v267_v3, %v263_v2  ;;  %v262_v7 = vld [vmem:[#allocation4 + $0x90] sm:$0xff] }
  0x34   :  { %2418 = vmatpush1.bf16.msra.mxu1 %v3252_v21  ;;  %2482 = vmatpush1.bf16.msra.mxu0 %v3252_v21  ;;  %v297_v38 = vld [vmem:[#allocation4 + $0x1a8] sm:$0xff]  ;;  %v296_v42 = vld [vmem:[#allocation4 + $0x1a0] sm:$0xff]  ;;  %v266_v8 = vld [vmem:[#allocation4 + $0xb0] sm:$0xff] }
  0x35   :  { %2420 = vmatprep.subr.bf16.mxu1 %v3256_v22  ;;  %2484 = vmatprep.subr.bf16.mxu0 %v3256_v22  ;;  %v3280_v40 = vpack.c.bf16 %v297_v38, %v293_v37  ;;  %v52_v43 = vld [vmem:[%s3796_s0] sm:$0xff]  ;;  %v301_v44 = vld [vmem:[#allocation4 + $0x1c8] sm:$0xff]  ;;  %v3290_v47 = vpack.c.bf16 %v296_v42, %v292_v41  ;;  %v271_v11 = vld [vmem:[#allocation4 + $0xd8] sm:$0xff] }
  0x36   :  { %v305_v45 = vld [vmem:[#allocation4 + $0x1e8] sm:$0xff]  ;;  %63 = vperm.xlu0 %2960, %v52_v43   ;;  %v300_v49 = vld [vmem:[#allocation4 + $0x1c0] sm:$0xff]  ;;  %v275_v12 = vld [vmem:[#allocation4 + $0xf8] sm:$0xff] }
  0x37   :  { %v53_v46 = vld [vmem:[%s3796_s0 + $0x8] sm:$0xff]  ;;  %v3294_v48 = vpack.c.bf16 %v305_v45, %v301_v44  ;;  %v304_v50 = vld [vmem:[#allocation4 + $0x1e0] sm:$0xff]  ;;  %v3331_v13 = vpack.c.bf16 %v275_v12, %v271_v11  ;;  %v270_v14 = vld [vmem:[#allocation4 + $0xd0] sm:$0xff] }
  0x38   :  { %2422 = vmatpush1.bf16.msra.mxu1 %v3260_v27  ;;  %2486 = vmatpush1.bf16.msra.mxu0 %v3260_v27  ;;  %v56_v53 = vld [vmem:[%s3796_s0 + $0x20] sm:$0xff]  ;;  %v3301_v54 = vpack.c.bf16 %v304_v50, %v300_v49  ;;  %v274_v17 = vld [vmem:[#allocation4 + $0xf0] sm:$0xff]  ;;  %v279_v18 = vld [vmem:[#allocation4 + $0x118] sm:$0xff] }
  0x39   :  { %2424 = vmatprep.subr.bf16.mxu1 %v3264_v28  ;;  %2488 = vmatprep.subr.bf16.mxu0 %v3264_v28  ;;  %v283_v19 = vld [vmem:[#allocation4 + $0x138] sm:$0xff]  ;;  %v3334_v20 = vpack.c.bf16 %v274_v17, %v270_v14  ;;  %v278_v24 = vld [vmem:[#allocation4 + $0x110] sm:$0xff]  ;;  %v60_v58 = vld [vmem:[%s3797_s1] sm:$0xf] }
  0x3a   :  { %68 = vperm.xlu0 %2960, %v53_v46   ;;  %v3337_v23 = vpack.c.bf16 %v283_v19, %v279_v18  ;;  %v282_v25 = vld [vmem:[#allocation4 + $0x130] sm:$0xff]  ;;  %v287_v26 = vld [vmem:[#allocation4 + $0x158] sm:$0xff]  ;;  %v154_v2 = vld [vmem:[%s3799_s3] sm:$0xf] }
  0x3b   :  { %v291_v29 = vld [vmem:[#allocation4 + $0x178] sm:$0xff]  ;;  %v3340_v30 = vpack.c.bf16 %v282_v25, %v278_v24  ;;  %v286_v32 = vld [vmem:[#allocation4 + $0x150] sm:$0xff] }
  0x3c   :  { %2426 = vmatpush1.bf16.msra.mxu1 %v3268_v33  ;;  %2490 = vmatpush1.bf16.msra.mxu0 %v3268_v33  ;;  %v3343_v31 = vpack.c.bf16 %v291_v29, %v287_v26  ;;  %v290_v35 = vld [vmem:[#allocation4 + $0x170] sm:$0xff]  ;;  %v295_v36 = vld [vmem:[#allocation4 + $0x198] sm:$0xff] }
  0x3d   :  { %2428 = vmatprep.subr.bf16.mxu1 %v3272_v34  ;;  %2492 = vmatprep.subr.bf16.mxu0 %v3272_v34  ;;  %v299_v37 = vld [vmem:[#allocation4 + $0x1b8] sm:$0xff]  ;;  %v3346_v38 = vpack.c.bf16 %v290_v35, %v286_v32  ;;  %v294_v42 = vld [vmem:[#allocation4 + $0x190] sm:$0xff] }
  0x3e   :  { %83 = vperm.xlu0 %2960, %v56_v53   ;;  %v3349_v41 = vpack.c.bf16 %v299_v37, %v295_v36  ;;  %v298_v43 = vld [vmem:[#allocation4 + $0x1b0] sm:$0xff]  ;;  %v303_v44 = vld [vmem:[#allocation4 + $0x1d8] sm:$0xff]  ;;  %v102_v53 = vlaneseq }
  0x3f   :  { %v307_v45 = vld [vmem:[#allocation4 + $0x1f8] sm:$0xff]  ;;  %v3352_v46 = vpack.c.bf16 %v298_v43, %v294_v42  ;;  %v302_v50 = vld [vmem:[#allocation4 + $0x1d0] sm:$0xff] }
  0x40   :  { %2430 = vmatpush1.bf16.msra.mxu1 %v3276_v39  ;;  %2494 = vmatpush1.bf16.msra.mxu0 %v3276_v39  ;;  %v3355_v49 = vpack.c.bf16 %v307_v45, %v303_v44  ;;  %v306_v51 = vld [vmem:[#allocation4 + $0x1f0] sm:$0xff]  ;;  %v103_v56 = vshrl.u32 %v102_v53, 7 }
  0x41   :  { %2432 = vmatprep.subr.bf16.mxu1 %v3280_v40  ;;  %2496 = vmatprep.subr.bf16.mxu0 %v3280_v40  ;;  %v3358_v52 = vpack.c.bf16 %v306_v51, %v302_v50 }
  0x42   :  { %93 = vperm.xlu0 %2960, %v58_v60   ;;  %v108_v57 = vsub.s32 1, %v103_v56  ;;  %v104_v59 = vsub.s32 0, %v103_v56  ;;  %v112_v29 = vsub.s32 2, %v103_v56  ;;  %v116_v32 = vsub.s32 3, %v103_v56 }
  0x44   :  { %2434 = vmatpush1.bf16.msra.mxu1 %v3290_v47  ;;  %2498 = vmatpush1.bf16.msra.mxu0 %v3290_v47  ;;  %v3384_v60 = vrot.slane %v60_v58, %v108_v57  ;;  %v3386_v1 = vrot.slane %v60_v58, %v104_v59  ;;  %v3395_v12 = vrot.slane %v154_v2, %v104_v59 }
  0x45   :  { %2436 = vmatprep.subr.bf16.mxu1 %v3294_v48  ;;  %2500 = vmatprep.subr.bf16.mxu0 %v3294_v48  ;;  %v3399_v35 = vrot.slane %v60_v58, %v112_v29  ;;  %v3401_v36 = vrot.slane %v60_v58, %v116_v32  ;;  %v3404_v44 = vrot.slane %v154_v2, %v112_v29 }
  0x46   :  { %v3407_v50 = vrot.slane %v154_v2, %v116_v32 }
  0x48   :  { %2438 = vmatpush1.bf16.msra.mxu1 %v3301_v54  ;;  %2502 = vmatpush1.bf16.msra.mxu0 %v3301_v54 }
  0x49   :  { %2440 = vmatprep.subr.bf16.mxu1 %v3305_v55  ;;  %2536 = vmatprep.subr.bf16.mxu0 %v3235_v5  ;;  %v3328_v5 = vpack.c.bf16 %v266_v8, %v262_v7  ;;  %v3392_v8 = vrot.slane %v154_v2, %v108_v57 }
  0x4b   :  { %373 = vmatmul.mubr.f32.vlgmr.msra.gmra.mrb[0].mxu1 %v3168_v0 }
  0x4c   :  { %2442 = vmatpush1.bf16.msra.mxu1 %v3312_v61  ;;  %443 = vmatprep.mubr.f32.mxu1 %v3168_v0 }
  0x4d   :  { %2444 = vmatprep.subr.bf16.mxu1 %v3316_v62 }
  0x50   :  { %2446 = vmatpush1.bf16.msra.mxu1 %v3321_v4 }
  0x51   :  { %2448 = vmatprep.subr.bf16.mxu1 %v3325_v6 }
  0x54   :  { %2450 = vmatpush1.bf16.msra.mxu1 %v3328_v5 }
  0x55   :  { %2452 = vmatprep.subr.bf16.mxu1 %v3331_v13 }
  0x58   :  { %2454 = vmatpush1.bf16.msra.mxu1 %v3334_v20 }
  0x59   :  { %2456 = vmatprep.subr.bf16.mxu1 %v3337_v23 }
  0x5c   :  { %2458 = vmatpush1.bf16.msra.mxu1 %v3340_v30 }
  0x5d   :  { %2460 = vmatprep.subr.bf16.mxu1 %v3343_v31 }
  0x60   :  { %2462 = vmatpush1.bf16.msra.mxu1 %v3346_v38 }
  0x61   :  { %2464 = vmatprep.subr.bf16.mxu1 %v3349_v41 }
  0x64   :  { %2466 = vmatpush1.bf16.msra.mxu1 %v3352_v46 }
  0x65   :  { %2468 = vmatprep.subr.bf16.mxu1 %v3355_v49 }
  0x68   :  { %2470 = vmatpush1.bf16.msra.mxu1 %v3358_v52 }
  0x69   :  { %2504 = vmatprep.subr.bf16.mxu1 %v3305_v55 }
  0x6b   :  { %444 = vmatmul.mubr.f32.vlgmr.msra.gmra.mrb[2].mxu1 %v3168_v0 }
  0x6c   :  { %2506 = vmatpush1.bf16.msra.mxu1 %v3312_v61  ;;  %682 = vmatprep.mubr.f32.mxu1 %v3168_v0 }
  0x6d   :  { %2508 = vmatprep.subr.bf16.mxu1 %v3316_v62 }
  0x70   :  { %2510 = vmatpush1.bf16.msra.mxu1 %v3321_v4 }
  0x71   :  { %2512 = vmatprep.subr.bf16.mxu1 %v3325_v6 }
  0x74   :  { %2514 = vmatpush1.bf16.msra.mxu1 %v3328_v5 }
  0x75   :  { %2516 = vmatprep.subr.bf16.mxu1 %v3331_v13 }
  0x78   :  { %2518 = vmatpush1.bf16.msra.mxu1 %v3334_v20 }
  0x79   :  { %2520 = vmatprep.subr.bf16.mxu1 %v3337_v23 }
  0x7c   :  { %2522 = vmatpush1.bf16.msra.mxu1 %v3340_v30 }
  0x7d   :  { %2524 = vmatprep.subr.bf16.mxu1 %v3343_v31 }
  0x80   :  { %2526 = vmatpush1.bf16.msra.mxu1 %v3346_v38 }
  0x81   :  { %2528 = vmatprep.subr.bf16.mxu1 %v3349_v41 }
  0x84   :  { %2530 = vmatpush1.bf16.msra.mxu1 %v3352_v46 }
  0x85   :  { %2532 = vmatprep.subr.bf16.mxu1 %v3355_v49 }
  0x88   :  { %2534 = vmatpush1.bf16.msra.mxu1 %v3358_v52 }
  0x89   :  { %2568 = vmatprep.subr.bf16.mxu1 %v3305_v55 }
  0xb5   :  { %v64_v63 = vpop.permute.xlu0 %63 }
  0xb6   :  { %v123_v7 = vmul.f32 %v3384_v60, %v64_v63  ;;  %v122_v11 = vmul.f32 %v3386_v1, %v64_v63  ;;  %v124_v43 = vmul.f32 %v3399_v35, %v64_v63  ;;  %v125_v45 = vmul.f32 %v3401_v36, %v64_v63 }
  0xb8   :  { %v177_v17 = vadd.f32 %v3392_v8, %v123_v7  ;;  %v176_v18 = vadd.f32 %v3395_v12, %v122_v11  ;;  %v178_v57 = vadd.f32 %v3404_v44, %v124_v43  ;;  %v179_v56 = vadd.f32 %v3407_v50, %v125_v45 }
 0x11e   :  { %v374_v3 = vpop.f32.mrb[0].mxu1 }
 0x11f   :  { %v376_v14 = vpop.f32.mrb[1].mxu1  ;;  %v450_v24 = vadd.f32 %v374_v3, %v176_v18 }
 0x120   :  { %v451_v19 = vadd.f32 %v376_v14, %v177_v17 }
 0x121   :  { %v2314_v26 = vmul.f32 -1.442695, %v450_v24 }
 0x122   :  { %v2315_v25 = vmul.f32 -1.442695, %v451_v19 }
 0x124   :  { %2962 = vpow2.f32 %v2315_v25 }
 0x125   :  { %2964 = vpow2.f32 %v2314_v26 }
 0x12e   :  { %v2963_v37 = vpop.eup %2962 }
 0x12f   :  { %v2965_v42 = vpop.eup %2964  ;;  %v463_v51 = vadd.f32 1.0, %v2963_v37 }
 0x130   :  { %v457_v53 = vadd.f32 1.0, %v2965_v42 }
 0x131   :  { %2966 = vrcp.f32 %v463_v51 }
 0x132   :  { %2968 = vrcp.f32 %v457_v53 }
 0x13b   :  { %v2967_v14 = vpop.eup %2966 }
 0x13c   :  { %v2969_v17 = vpop.eup %2968  ;;  %v473_v2 = vmul.f32 0.0, %v2967_v14 }
 0x13e   :  { %v445_v59 = vpop.f32.mrb[2].mxu1 }
 0x13f   :  { %v452_v58 = vadd.f32 %v445_v59, %v178_v57  ;;  %v447_v3 = vpop.f32.mrb[3].mxu1 }
 0x140   :  { %v453_v7 = vadd.f32 %v447_v3, %v179_v56 }
 0x141   :  { %2970 = vtanh.f32 %v452_v58 }
 0x142   :  { %v2316_v11 = vmul.f32 -1.442695, %v453_v7 }
 0x144   :  { %2972 = vpow2.f32 %v2316_v11 }
 0x14b   :  { %v2971_v63 = vpop.eup %2970 }
 0x14c   :  { %v474_v18 = vmul.f32 %v2971_v63, %v2969_v17  ;;  %v962_v17 = vld [vmem:[#allocation4 + $0x8] sm:$0xff] }
 0x14d   :  { %v966_v63 = vld [vmem:[#allocation4 + $0x28] sm:$0xff] }
 0x14e   :  { %v2973_v19 = vpop.eup %2972  ;;  %v3411_v24 = vadd.f32 %v474_v18, %v473_v2  ;;  %v3487_v2 = vpack.c.bf16 %v966_v63, %v962_v17  ;;  %v961_v18 = vld [vmem:[#allocation4] sm:$0xff]  ;;  %v1014_v17 = vld [vmem:[#allocation4 + $0x1a8] sm:$0xff]  ;;  %v1012_v63 = vld [vmem:[#allocation4 + $0x198] sm:$0xff] }
 0x14f   :  { %v470_v25 = vadd.f32 1.0, %v2973_v19 }
 0x150   :  { %2974 = vtanh.f32 %v3411_v24 }
 0x151   :  { %2976 = vrcp.f32 %v470_v25 }
 0x15a   :  { %v2975_v26 = vpop.eup %2974 }
 0x15b   :  { %v2977_v29 = vpop.eup %2976 }
 0x15c   :  { %v3414_v32 = vmul.f32 %v2977_v29, %v2975_v26  ;;  %v982_v26 = vld [vmem:[#allocation4 + $0xa8] sm:$0xff] }
 0x15e   :  { %612 = vmatmul.mubr.f32.vlgmr.msra.gmra.mrb[0].mxu0 %v3414_v32  ;;  %683 = vmatmul.mubr.f32.vlgmr.msra.gmra.mrb[4].mxu1 %v3414_v32 }
 0x15f   :  { %2538 = vmatpush1.bf16.msra.mxu0 %v3237_v9  ;;  %2570 = vmatpush1.bf16.msra.mxu1 %v3312_v61  ;;  %v54_v9 = vld [vmem:[%s3796_s0 + $0x10] sm:$0xff] }
 0x160   :  { %2540 = vmatprep.subr.bf16.mxu0 %v3239_v10  ;;  %2572 = vmatprep.subr.bf16.mxu1 %v3316_v62  ;;  %v55_v10 = vld [vmem:[%s3796_s0 + $0x18] sm:$0xff] }
 0x161   :  { %850 = vmatprep.mubr.f32.mxu0 %v3168_v0  ;;  %921 = vmatprep.mubr.f32.mxu1 %v3168_v0 }
 0x162   :  { %73 = vperm.xlu1 %2961, %v54_v9   ;;  %v977_v9 = vld [vmem:[#allocation4 + $0x80] sm:$0xff] }
 0x163   :  { %2542 = vmatpush1.bf16.msra.mxu0 %v3244_v15  ;;  %2574 = vmatpush1.bf16.msra.mxu1 %v3321_v4  ;;  %v57_v15 = vld [vmem:[%s3796_s0 + $0x28] sm:$0xff] }
 0x164   :  { %2544 = vmatprep.subr.bf16.mxu0 %v3248_v16  ;;  %2576 = vmatprep.subr.bf16.mxu1 %v3325_v6  ;;  %v59_v16 = vld [vmem:[%s3796_s0 + $0x38] sm:$0xff] }
 0x166   :  { %78 = vperm.xlu1 %2961, %v55_v10   ;;  %v981_v10 = vld [vmem:[#allocation4 + $0xa0] sm:$0xff] }
 0x167   :  { %2546 = vmatpush1.bf16.msra.mxu0 %v3252_v21  ;;  %2578 = vmatpush1.bf16.msra.mxu1 %v3328_v5  ;;  %v69_v21 = vpop.permute.xlu0 %68 }
 0x168   :  { %2548 = vmatprep.subr.bf16.mxu0 %v3256_v22  ;;  %2580 = vmatprep.subr.bf16.mxu1 %v3331_v13  ;;  %v126_v22 = vmul.f32 %v3386_v1, %v69_v21 }
 0x16a   :  { %88 = vperm.xlu1 %2961, %v57_v15   ;;  %v3501_v15 = vpack.c.bf16 %v981_v10, %v977_v9  ;;  %v1018_v9 = vld [vmem:[#allocation4 + $0x1c8] sm:$0xff] }
 0x16b   :  { %2550 = vmatpush1.bf16.msra.mxu0 %v3260_v27  ;;  %2582 = vmatpush1.bf16.msra.mxu1 %v3334_v20  ;;  %v127_v27 = vmul.f32 %v3384_v60, %v69_v21  ;;  %v1022_v10 = vld [vmem:[#allocation4 + $0x1e8] sm:$0xff] }
 0x16c   :  { %2552 = vmatprep.subr.bf16.mxu0 %v3264_v28  ;;  %2584 = vmatprep.subr.bf16.mxu1 %v3337_v23  ;;  %v180_v28 = vadd.f32 %v3395_v12, %v126_v22 }
 0x16e   :  { %98 = vperm.xlu1 %2961, %v59_v16   ;;  %v986_v16 = vld [vmem:[#allocation4 + $0xc8] sm:$0xff] }
 0x16f   :  { %2554 = vmatpush1.bf16.msra.mxu0 %v3268_v33  ;;  %2586 = vmatpush1.bf16.msra.mxu1 %v3340_v30 }
 0x170   :  { %2556 = vmatprep.subr.bf16.mxu0 %v3272_v34  ;;  %2588 = vmatprep.subr.bf16.mxu1 %v3343_v31  ;;  %v128_v31 = vmul.f32 %v3399_v35, %v69_v21 }
 0x173   :  { %2558 = vmatpush1.bf16.msra.mxu0 %v3276_v39  ;;  %2590 = vmatpush1.bf16.msra.mxu1 %v3346_v38  ;;  %v181_v39 = vadd.f32 %v3392_v8, %v127_v27  ;;  %v985_v27 = vld [vmem:[#allocation4 + $0xc0] sm:$0xff] }
 0x174   :  { %2560 = vmatprep.subr.bf16.mxu0 %v3280_v40  ;;  %2592 = vmatprep.subr.bf16.mxu1 %v3349_v41  ;;  %v182_v41 = vadd.f32 %v3404_v44, %v128_v31 }
 0x177   :  { %2562 = vmatpush1.bf16.msra.mxu0 %v3290_v47  ;;  %2594 = vmatpush1.bf16.msra.mxu1 %v3352_v46 }
 0x178   :  { %2564 = vmatprep.subr.bf16.mxu0 %v3294_v48  ;;  %2596 = vmatprep.subr.bf16.mxu1 %v3355_v49 }
 0x17b   :  { %2566 = vmatpush1.bf16.msra.mxu0 %v3301_v54  ;;  %2598 = vmatpush1.bf16.msra.mxu1 %v3358_v52 }
 0x17c   :  { %2632 = vmatprep.subr.bf16.mxu1 %v3305_v55  ;;  %v129_v55 = vmul.f32 %v3401_v36, %v69_v21  ;;  %2600 = vmatprep.subr.bf16.mxu0 %v3487_v2  ;;  %v990_v21 = vld [vmem:[#allocation4 + $0xe8] sm:$0xff] }
 0x17d   :  { %v3505_v22 = vpack.c.bf16 %v990_v21, %v986_v16  ;;  %v3547_v21 = vpack.c.bf16 %v1022_v10, %v1018_v9 }
 0x17e   :  { %v183_v30 = vadd.f32 %v3407_v50, %v129_v55 }
 0x231   :  { %v613_v33 = vpop.f32.mrb[0].mxu0  ;;  %v684_v34 = vpop.f32.mrb[4].mxu1 }
 0x232   :  { %v689_v40 = vadd.f32 %v613_v33, %v180_v28  ;;  %v615_v47 = vpop.f32.mrb[1].mxu0  ;;  %v686_v48 = vpop.f32.mrb[5].mxu1  ;;  %v691_v49 = vadd.f32 %v684_v34, %v182_v41  ;;  %v989_v28 = vld [vmem:[#allocation4 + $0xe0] sm:$0xff]  ;;  %v987_v33 = vld [vmem:[#allocation4 + $0xd0] sm:$0xff] }
 0x233   :  { %v690_v54 = vadd.f32 %v615_v47, %v181_v39  ;;  %v692_v38 = vadd.f32 %v686_v48, %v183_v30  ;;  %v3507_v34 = vpack.c.bf16 %v989_v28, %v985_v27  ;;  %v991_v39 = vld [vmem:[#allocation4 + $0xf0] sm:$0xff]  ;;  %v994_v47 = vld [vmem:[#allocation4 + $0x108] sm:$0xff]  ;;  %v997_v30 = vld [vmem:[#allocation4 + $0x120] sm:$0xff] }
 0x234   :  { %v2317_v20 = vmul.f32 -1.442695, %v689_v40  ;;  %v3510_v40 = vpack.c.bf16 %v991_v39, %v987_v33  ;;  %v998_v48 = vld [vmem:[#allocation4 + $0x128] sm:$0xff]  ;;  %v995_v41 = vld [vmem:[#allocation4 + $0x110] sm:$0xff]  ;;  %v1020_v27 = vld [vmem:[#allocation4 + $0x1d8] sm:$0xff] }
 0x235   :  { %v2318_v23 = vmul.f32 -1.442695, %v690_v54  ;;  %v2319_v46 = vmul.f32 -1.442695, %v692_v38  ;;  %v996_v54 = vld [vmem:[#allocation4 + $0x118] sm:$0xff]  ;;  %v3514_v55 = vpack.c.bf16 %v998_v48, %v994_v47  ;;  %v1017_v33 = vld [vmem:[#allocation4 + $0x1c0] sm:$0xff] }
 0x236   :  { %2978 = vpow2.f32 %v2317_v20  ;;  %v1000_v20 = vld [vmem:[#allocation4 + $0x138] sm:$0xff]  ;;  %v1021_v47 = vld [vmem:[#allocation4 + $0x1e0] sm:$0xff]  ;;  %v1019_v48 = vld [vmem:[#allocation4 + $0x1d0] sm:$0xff] }
 0x237   :  { %2980 = vpow2.f32 %v2318_v23  ;;  %v993_v23 = vld [vmem:[#allocation4 + $0x100] sm:$0xff]  ;;  %v3516_v31 = vpack.c.bf16 %v1000_v20, %v996_v54  ;;  %v1024_v28 = vld [vmem:[#allocation4 + $0x1f8] sm:$0xff]  ;;  %v1023_v54 = vld [vmem:[#allocation4 + $0x1f0] sm:$0xff]  ;;  %v3553_v20 = vpack.c.bf16 %v1021_v47, %v1017_v33 }
 0x238   :  { %2982 = vpow2.f32 %v2319_v46  ;;  %v3518_v38 = vpack.c.bf16 %v997_v30, %v993_v23  ;;  %v999_v46 = vld [vmem:[#allocation4 + $0x130] sm:$0xff]  ;;  %v3550_v39 = vpack.c.bf16 %v1024_v28, %v1020_v27  ;;  %v3557_v23 = vpack.c.bf16 %v1023_v54, %v1019_v48  ;;  %v74_v30 = vpop.permute.xlu1 %73 }
 0x239   :  { %2984 = vtanh.f32 %v691_v49  ;;  %v3521_v49 = vpack.c.bf16 %v999_v46, %v995_v41  ;;  %v130_v41 = vmul.f32 %v3386_v1, %v74_v30  ;;  %v131_v46 = vmul.f32 %v3384_v60, %v74_v30 }
 0x240   :  { %v2979_v52 = vpop.eup %2978 }
 0x241   :  { %v2981_v37 = vpop.eup %2980  ;;  %v696_v42 = vadd.f32 1.0, %v2979_v52  ;;  %v1002_v52 = vld [vmem:[#allocation4 + $0x148] sm:$0xff] }
 0x242   :  { %v702_v43 = vadd.f32 1.0, %v2981_v37  ;;  %v2983_v45 = vpop.eup %2982  ;;  %v1006_v37 = vld [vmem:[#allocation4 + $0x168] sm:$0xff] }
 0x243   :  { %2986 = vrcp.f32 %v696_v42  ;;  %v2985_v51 = vpop.eup %2984  ;;  %v709_v56 = vadd.f32 1.0, %v2983_v45  ;;  %v1004_v42 = vld [vmem:[#allocation4 + $0x158] sm:$0xff] }
 0x244   :  { %2988 = vrcp.f32 %v702_v43  ;;  %v3525_v43 = vpack.c.bf16 %v1006_v37, %v1002_v52  ;;  %v1008_v45 = vld [vmem:[#allocation4 + $0x178] sm:$0xff]  ;;  %v184_v52 = vadd.f32 %v3395_v12, %v130_v41  ;;  %v185_v37 = vadd.f32 %v3392_v8, %v131_v46 }
 0x245   :  { %2990 = vrcp.f32 %v709_v56  ;;  %v1003_v56 = vld [vmem:[#allocation4 + $0x150] sm:$0xff] }
 0x24d   :  { %v2987_v53 = vpop.eup %2986 }
 0x24e   :  { %v2989_v57 = vpop.eup %2988  ;;  %v713_v59 = vmul.f32 %v2987_v53, %v2985_v51  ;;  %v1001_v51 = vld [vmem:[#allocation4 + $0x140] sm:$0xff] }
 0x24f   :  { %v712_v58 = vmul.f32 %v2989_v57, %v3411_v24  ;;  %v2991_v7 = vpop.eup %2990  ;;  %v1005_v53 = vld [vmem:[#allocation4 + $0x160] sm:$0xff]  ;;  %v3528_v57 = vpack.c.bf16 %v1008_v45, %v1004_v42 }
 0x251   :  { %v3472_v3 = vadd.f32 %v713_v59, %v712_v58  ;;  %v3530_v59 = vpack.c.bf16 %v1005_v53, %v1001_v51  ;;  %v1007_v58 = vld [vmem:[#allocation4 + $0x170] sm:$0xff]  ;;  %v133_v51 = vmul.f32 %v3401_v36, %v74_v30 }
 0x253   :  { %2992 = vtanh.f32 %v3472_v3 }
 0x25d   :  { %v2993_v11 = vpop.eup %2992 }
 0x25e   :  { %v3475_v14 = vmul.f32 %v2993_v11, %v2991_v7  ;;  %v1010_v7 = vld [vmem:[#allocation4 + $0x188] sm:$0xff]  ;;  %v3533_v11 = vpack.c.bf16 %v1007_v58, %v1003_v56 }
 0x260   :  { %851 = vmatmul.mubr.f32.vlgmr.msra.gmra.mrb[2].mxu0 %v3475_v14  ;;  %922 = vmatmul.mubr.f32.vlgmr.msra.gmra.mrb[6].mxu1 %v3475_v14 }
 0x261   :  { %2634 = vmatpush1.bf16.msra.mxu1 %v3312_v61  ;;  %1089 = vmatprep.mubr.f32.mxu0 %v3168_v0  ;;  %v965_v61 = vld [vmem:[#allocation4 + $0x20] sm:$0xff] }
 0x262   :  { %2636 = vmatprep.subr.bf16.mxu1 %v3316_v62  ;;  %1160 = vmatprep.mubr.f32.mxu1 %v3168_v0  ;;  %v3489_v19 = vpack.c.bf16 %v965_v61, %v961_v18  ;;  %v970_v62 = vld [vmem:[#allocation4 + $0x48] sm:$0xff]  ;;  %v1016_v18 = vld [vmem:[#allocation4 + $0x1b8] sm:$0xff]  ;;  %v3536_v61 = vpack.c.bf16 %v1014_v17, %v1010_v7 }
 0x264   :  { %2602 = vmatpush1.bf16.msra.mxu0 %v3489_v19 }
 0x265   :  { %2638 = vmatpush1.bf16.msra.mxu1 %v3321_v4  ;;  %v974_v4 = vld [vmem:[#allocation4 + $0x68] sm:$0xff] }
 0x266   :  { %2640 = vmatprep.subr.bf16.mxu1 %v3325_v6  ;;  %v3493_v24 = vpack.c.bf16 %v974_v4, %v970_v62  ;;  %v969_v6 = vld [vmem:[#allocation4 + $0x40] sm:$0xff]  ;;  %v3538_v62 = vpack.c.bf16 %v1016_v18, %v1012_v63  ;;  %v187_v18 = vadd.f32 %v3407_v50, %v133_v51 }
 0x267   :  { %v1009_v4 = vld [vmem:[#allocation4 + $0x180] sm:$0xff] }
 0x268   :  { %2604 = vmatprep.subr.bf16.mxu0 %v3493_v24 }
 0x269   :  { %2642 = vmatpush1.bf16.msra.mxu1 %v3328_v5  ;;  %v973_v5 = vld [vmem:[#allocation4 + $0x60] sm:$0xff] }
 0x26a   :  { %2644 = vmatprep.subr.bf16.mxu1 %v3331_v13  ;;  %v3495_v25 = vpack.c.bf16 %v973_v5, %v969_v6  ;;  %v978_v13 = vld [vmem:[#allocation4 + $0x88] sm:$0xff]  ;;  %v1013_v6 = vld [vmem:[#allocation4 + $0x1a0] sm:$0xff]  ;;  %v1011_v5 = vld [vmem:[#allocation4 + $0x190] sm:$0xff] }
 0x26b   :  { %v3499_v29 = vpack.c.bf16 %v982_v26, %v978_v13  ;;  %v3541_v13 = vpack.c.bf16 %v1013_v6, %v1009_v4  ;;  %v1015_v26 = vld [vmem:[#allocation4 + $0x1b0] sm:$0xff]  ;;  %v132_v4 = vmul.f32 %v3399_v35, %v74_v30 }
 0x26c   :  { %2606 = vmatpush1.bf16.msra.mxu0 %v3495_v25  ;;  %v3545_v16 = vpack.c.bf16 %v1015_v26, %v1011_v5 }
 0x26d   :  { %2608 = vmatprep.subr.bf16.mxu0 %v3499_v29  ;;  %2646 = vmatpush1.bf16.msra.mxu1 %v3510_v40  ;;  %v186_v5 = vadd.f32 %v3404_v44, %v132_v4 }
 0x26e   :  { %2648 = vmatprep.subr.bf16.mxu1 %v3516_v31 }
 0x270   :  { %2610 = vmatpush1.bf16.msra.mxu0 %v3501_v15 }
 0x271   :  { %2612 = vmatprep.subr.bf16.mxu0 %v3505_v22  ;;  %2650 = vmatpush1.bf16.msra.mxu1 %v3521_v49 }
 0x272   :  { %2652 = vmatprep.subr.bf16.mxu1 %v3528_v57 }
 0x274   :  { %2614 = vmatpush1.bf16.msra.mxu0 %v3507_v34 }
 0x275   :  { %2616 = vmatprep.subr.bf16.mxu0 %v3514_v55  ;;  %2654 = vmatpush1.bf16.msra.mxu1 %v3533_v11 }
 0x276   :  { %2656 = vmatprep.subr.bf16.mxu1 %v3538_v62 }
 0x278   :  { %2618 = vmatpush1.bf16.msra.mxu0 %v3518_v38 }
 0x279   :  { %2620 = vmatprep.subr.bf16.mxu0 %v3525_v43  ;;  %2658 = vmatpush1.bf16.msra.mxu1 %v3545_v16 }
 0x27a   :  { %2660 = vmatprep.subr.bf16.mxu1 %v3550_v39 }
 0x27c   :  { %2622 = vmatpush1.bf16.msra.mxu0 %v3530_v59 }
 0x27d   :  { %2624 = vmatprep.subr.bf16.mxu0 %v3536_v61  ;;  %2662 = vmatpush1.bf16.msra.mxu1 %v3557_v23 }
 0x280   :  { %2626 = vmatpush1.bf16.msra.mxu0 %v3541_v13 }
 0x281   :  { %2628 = vmatprep.subr.bf16.mxu0 %v3547_v21 }
 0x284   :  { %2630 = vmatpush1.bf16.msra.mxu0 %v3553_v20 }
 0x285   :  { %2664 = vmatprep.subr.bf16.mxu0 %v3487_v2 }
 0x333   :  { %v852_v42 = vpop.f32.mrb[2].mxu0  ;;  %v923_v45 = vpop.f32.mrb[6].mxu1 }
 0x334   :  { %v928_v53 = vadd.f32 %v852_v42, %v184_v52  ;;  %v854_v56 = vpop.f32.mrb[3].mxu0  ;;  %v925_v58 = vpop.f32.mrb[7].mxu1  ;;  %v930_v9 = vadd.f32 %v923_v45, %v186_v5  ;;  %v1214_v5 = vld [vmem:[#allocation4 + $0x70] sm:$0xff] }
 0x335   :  { %v929_v7 = vadd.f32 %v854_v56, %v185_v37  ;;  %v931_v6 = vadd.f32 %v925_v58, %v187_v18  ;;  %v1202_v58 = vld [vmem:[#allocation4 + $0x10] sm:$0xff]  ;;  %v1215_v18 = vld [vmem:[#allocation4 + $0x78] sm:$0xff] }
 0x336   :  { %v2320_v17 = vmul.f32 -1.442695, %v928_v53  ;;  %v1207_v53 = vld [vmem:[#allocation4 + $0x38] sm:$0xff] }
 0x337   :  { %v2321_v63 = vmul.f32 -1.442695, %v929_v7  ;;  %v2322_v26 = vmul.f32 -1.442695, %v931_v6  ;;  %v1206_v7 = vld [vmem:[#allocation4 + $0x30] sm:$0xff] }
 0x338   :  { %2994 = vpow2.f32 %v2320_v17  ;;  %v3599_v17 = vpack.c.bf16 %v1206_v7, %v1202_v58  ;;  %v1210_v6 = vld [vmem:[#allocation4 + $0x50] sm:$0xff] }
 0x339   :  { %2996 = vpow2.f32 %v2321_v63  ;;  %v1211_v63 = vld [vmem:[#allocation4 + $0x58] sm:$0xff] }
 0x33a   :  { %2998 = vpow2.f32 %v2322_v26  ;;  %v3603_v4 = vpack.c.bf16 %v1215_v18, %v1211_v63  ;;  %v3605_v26 = vpack.c.bf16 %v1214_v5, %v1210_v6 }
 0x33b   :  { %3000 = vtanh.f32 %v930_v9  ;;  %v1219_v9 = vld [vmem:[#allocation4 + $0x98] sm:$0xff] }
 0x342   :  { %v2995_v10 = vpop.eup %2994 }
 0x343   :  { %v2997_v27 = vpop.eup %2996  ;;  %v935_v28 = vadd.f32 1.0, %v2995_v10  ;;  %v1223_v10 = vld [vmem:[#allocation4 + $0xb8] sm:$0xff] }
 0x344   :  { %v941_v33 = vadd.f32 1.0, %v2997_v27  ;;  %v2999_v47 = vpop.eup %2998  ;;  %v3609_v27 = vpack.c.bf16 %v1223_v10, %v1219_v9 }
 0x345   :  { %3002 = vrcp.f32 %v935_v28  ;;  %v3001_v48 = vpop.eup %3000  ;;  %v948_v30 = vadd.f32 1.0, %v2999_v47  ;;  %v1218_v28 = vld [vmem:[#allocation4 + $0x90] sm:$0xff] }
 0x346   :  { %3004 = vrcp.f32 %v941_v33  ;;  %v1222_v33 = vld [vmem:[#allocation4 + $0xb0] sm:$0xff] }
 0x347   :  { %3006 = vrcp.f32 %v948_v30  ;;  %v3611_v47 = vpack.c.bf16 %v1222_v33, %v1218_v28 }
 0x34f   :  { %v3003_v54 = vpop.eup %3002 }
 0x350   :  { %v3005_v41 = vpop.eup %3004  ;;  %v952_v46 = vmul.f32 %v3003_v54, %v3001_v48  ;;  %v1227_v48 = vld [vmem:[#allocation4 + $0xd8] sm:$0xff] }
 0x351   :  { %v951_v52 = vmul.f32 %v3005_v41, %v3472_v3  ;;  %v3007_v42 = vpop.eup %3006  ;;  %v1203_v3 = vld [vmem:[#allocation4 + $0x18] sm:$0xff] }
 0x352   :  { %v3597_v56 = vpack.c.bf16 %v1207_v53, %v1203_v3  ;;  %v1231_v54 = vld [vmem:[#allocation4 + $0xf8] sm:$0xff] }
 0x353   :  { %v3572_v37 = vadd.f32 %v952_v46, %v951_v52  ;;  %v3615_v41 = vpack.c.bf16 %v1231_v54, %v1227_v48  ;;  %v79_v46 = vpop.permute.xlu1 %78 }
 0x354   :  { %2696 = vmatprep.subr.bf16.mxu1 %v3597_v56  ;;  %v134_v30 = vmul.f32 %v3386_v1, %v79_v46  ;;  %v135_v52 = vmul.f32 %v3384_v60, %v79_v46  ;;  %v137_v6 = vmul.f32 %v3401_v36, %v79_v46  ;;  %v136_v28 = vmul.f32 %v3399_v35, %v79_v46 }
 0x355   :  { %3008 = vtanh.f32 %v3572_v37 }
 0x356   :  { %v189_v53 = vadd.f32 %v3392_v8, %v135_v52  ;;  %v191_v10 = vadd.f32 %v3407_v50, %v137_v6  ;;  %v190_v48 = vadd.f32 %v3404_v44, %v136_v28 }
 0x35f   :  { %v3009_v45 = vpop.eup %3008 }
 0x360   :  { %v3575_v51 = vmul.f32 %v3009_v45, %v3007_v42  ;;  %v188_v42 = vadd.f32 %v3395_v12, %v134_v30 }
 0x362   :  { %1090 = vmatmul.mubr.f32.vlgmr.msra.gmra.mrb[4].mxu0 %v3575_v51  ;;  %1161 = vmatmul.mubr.f32.vlgmr.msra.gmra.mrb[8].mxu1 %v3575_v51 }
 0x363   :  { %2666 = vmatpush1.bf16.msra.mxu0 %v3489_v19  ;;  %1328 = vmatprep.mubr.f32.mxu0 %v3168_v0 }
 0x364   :  { %2668 = vmatprep.subr.bf16.mxu0 %v3493_v24  ;;  %1399 = vmatprep.mubr.f32.mxu1 %v3168_v0 }
 0x365   :  { %2698 = vmatpush1.bf16.msra.mxu1 %v3599_v17 }
 0x366   :  { %2700 = vmatprep.subr.bf16.mxu1 %v3603_v4 }
 0x367   :  { %2670 = vmatpush1.bf16.msra.mxu0 %v3495_v25 }
 0x368   :  { %2672 = vmatprep.subr.bf16.mxu0 %v3499_v29 }
 0x369   :  { %2702 = vmatpush1.bf16.msra.mxu1 %v3605_v26 }
 0x36a   :  { %2704 = vmatprep.subr.bf16.mxu1 %v3609_v27 }
 0x36b   :  { %2674 = vmatpush1.bf16.msra.mxu0 %v3501_v15 }
 0x36c   :  { %2676 = vmatprep.subr.bf16.mxu0 %v3505_v22 }
 0x36d   :  { %2706 = vmatpush1.bf16.msra.mxu1 %v3611_v47 }
 0x36e   :  { %2708 = vmatprep.subr.bf16.mxu1 %v3615_v41 }
 0x36f   :  { %2678 = vmatpush1.bf16.msra.mxu0 %v3507_v34 }
 0x370   :  { %2680 = vmatprep.subr.bf16.mxu0 %v3514_v55 }
 0x371   :  { %2710 = vmatpush1.bf16.msra.mxu1 %v3510_v40 }
 0x372   :  { %2712 = vmatprep.subr.bf16.mxu1 %v3516_v31 }
 0x373   :  { %2682 = vmatpush1.bf16.msra.mxu0 %v3518_v38 }
 0x374   :  { %2684 = vmatprep.subr.bf16.mxu0 %v3525_v43 }
 0x375   :  { %2714 = vmatpush1.bf16.msra.mxu1 %v3521_v49 }
 0x376   :  { %2716 = vmatprep.subr.bf16.mxu1 %v3528_v57 }
 0x377   :  { %2686 = vmatpush1.bf16.msra.mxu0 %v3530_v59 }
 0x378   :  { %2688 = vmatprep.subr.bf16.mxu0 %v3536_v61 }
 0x379   :  { %2718 = vmatpush1.bf16.msra.mxu1 %v3533_v11 }
 0x37a   :  { %2720 = vmatprep.subr.bf16.mxu1 %v3538_v62 }
 0x37b   :  { %2690 = vmatpush1.bf16.msra.mxu0 %v3541_v13 }
 0x37c   :  { %2692 = vmatprep.subr.bf16.mxu0 %v3547_v21 }
 0x37d   :  { %2722 = vmatpush1.bf16.msra.mxu1 %v3545_v16 }
 0x37e   :  { %2724 = vmatprep.subr.bf16.mxu1 %v3550_v39 }
 0x37f   :  { %2694 = vmatpush1.bf16.msra.mxu0 %v3553_v20 }
 0x380   :  { %2728 = vmatprep.subr.bf16.mxu0 %v3487_v2 }
 0x381   :  { %2726 = vmatpush1.bf16.msra.mxu1 %v3557_v23 }
 0x382   :  { %2760 = vmatprep.subr.bf16.mxu1 %v3597_v56 }
 0x435   :  { %v1091_v45 = vpop.f32.mrb[4].mxu0  ;;  %v1162_v3 = vpop.f32.mrb[8].mxu1 }
 0x436   :  { %v1167_v58 = vadd.f32 %v1091_v45, %v188_v42  ;;  %v1093_v7 = vpop.f32.mrb[5].mxu0  ;;  %v1164_v63 = vpop.f32.mrb[9].mxu1  ;;  %v1169_v30 = vadd.f32 %v1162_v3, %v190_v48 }
 0x437   :  { %v1168_v18 = vadd.f32 %v1093_v7, %v189_v53  ;;  %v1170_v33 = vadd.f32 %v1164_v63, %v191_v10 }
 0x438   :  { %v2323_v5 = vmul.f32 -1.442695, %v1167_v58 }
 0x439   :  { %v2324_v9 = vmul.f32 -1.442695, %v1168_v18  ;;  %v2325_v54 = vmul.f32 -1.442695, %v1170_v33 }
 0x43a   :  { %3010 = vpow2.f32 %v2323_v5 }
 0x43b   :  { %3012 = vpow2.f32 %v2324_v9 }
 0x43c   :  { %3014 = vpow2.f32 %v2325_v54 }
 0x43d   :  { %3016 = vtanh.f32 %v1169_v30 }
 0x444   :  { %v3011_v52 = vpop.eup %3010 }
 0x445   :  { %v3013_v42 = vpop.eup %3012  ;;  %v1174_v45 = vadd.f32 1.0, %v3011_v52 }
 0x446   :  { %v1180_v53 = vadd.f32 1.0, %v3013_v42  ;;  %v3015_v58 = vpop.eup %3014 }
 0x447   :  { %3018 = vrcp.f32 %v1174_v45  ;;  %v3017_v7 = vpop.eup %3016  ;;  %v1187_v9 = vadd.f32 1.0, %v3015_v58 }
 0x448   :  { %3020 = vrcp.f32 %v1180_v53 }
 0x449   :  { %3022 = vrcp.f32 %v1187_v9 }
 0x451   :  { %v3019_v18 = vpop.eup %3018 }
 0x452   :  { %v3021_v5 = vpop.eup %3020  ;;  %v1191_v6 = vmul.f32 %v3019_v18, %v3017_v7 }
 0x453   :  { %v1190_v46 = vmul.f32 %v3021_v5, %v3572_v37  ;;  %v3023_v3 = vpop.eup %3022  ;;  %v84_v37 = vpop.permute.xlu0 %83 }
 0x454   :  { %v138_v33 = vmul.f32 %v3386_v1, %v84_v37  ;;  %v139_v48 = vmul.f32 %v3384_v60, %v84_v37  ;;  %v141_v18 = vmul.f32 %v3401_v36, %v84_v37  ;;  %v140_v9 = vmul.f32 %v3399_v35, %v84_v37 }
 0x455   :  { %v3637_v63 = vadd.f32 %v1191_v6, %v1190_v46 }
 0x456   :  { %v192_v54 = vadd.f32 %v3395_v12, %v138_v33  ;;  %v193_v42 = vadd.f32 %v3392_v8, %v139_v48  ;;  %v195_v6 = vadd.f32 %v3407_v50, %v141_v18 }
 0x457   :  { %3024 = vtanh.f32 %v3637_v63 }
 0x461   :  { %v3025_v10 = vpop.eup %3024 }
 0x462   :  { %v3640_v28 = vmul.f32 %v3025_v10, %v3023_v3  ;;  %v194_v3 = vadd.f32 %v3404_v44, %v140_v9 }
 0x464   :  { %1329 = vmatmul.mubr.f32.vlgmr.msra.gmra.mrb[6].mxu0 %v3640_v28  ;;  %1400 = vmatmul.mubr.f32.vlgmr.msra.gmra.mrb[10].mxu1 %v3640_v28 }
 0x465   :  { %2730 = vmatpush1.bf16.msra.mxu0 %v3489_v19  ;;  %2762 = vmatpush1.bf16.msra.mxu1 %v3599_v17 }
 0x466   :  { %2732 = vmatprep.subr.bf16.mxu0 %v3493_v24  ;;  %2764 = vmatprep.subr.bf16.mxu1 %v3603_v4 }
 0x467   :  { %1567 = vmatprep.mubr.f32.mxu0 %v3168_v0  ;;  %1638 = vmatprep.mubr.f32.mxu1 %v3168_v0 }
 0x469   :  { %2734 = vmatpush1.bf16.msra.mxu0 %v3495_v25  ;;  %2766 = vmatpush1.bf16.msra.mxu1 %v3605_v26 }
 0x46a   :  { %2736 = vmatprep.subr.bf16.mxu0 %v3499_v29  ;;  %2768 = vmatprep.subr.bf16.mxu1 %v3609_v27 }
 0x46d   :  { %2738 = vmatpush1.bf16.msra.mxu0 %v3501_v15  ;;  %2770 = vmatpush1.bf16.msra.mxu1 %v3611_v47 }
 0x46e   :  { %2740 = vmatprep.subr.bf16.mxu0 %v3505_v22  ;;  %2772 = vmatprep.subr.bf16.mxu1 %v3615_v41 }
 0x471   :  { %2742 = vmatpush1.bf16.msra.mxu0 %v3507_v34  ;;  %2774 = vmatpush1.bf16.msra.mxu1 %v3510_v40 }
 0x472   :  { %2744 = vmatprep.subr.bf16.mxu0 %v3514_v55  ;;  %2776 = vmatprep.subr.bf16.mxu1 %v3516_v31 }
 0x475   :  { %2746 = vmatpush1.bf16.msra.mxu0 %v3518_v38  ;;  %2778 = vmatpush1.bf16.msra.mxu1 %v3521_v49 }
 0x476   :  { %2748 = vmatprep.subr.bf16.mxu0 %v3525_v43  ;;  %2780 = vmatprep.subr.bf16.mxu1 %v3528_v57 }
 0x479   :  { %2750 = vmatpush1.bf16.msra.mxu0 %v3530_v59  ;;  %2782 = vmatpush1.bf16.msra.mxu1 %v3533_v11 }
 0x47a   :  { %2752 = vmatprep.subr.bf16.mxu0 %v3536_v61  ;;  %2784 = vmatprep.subr.bf16.mxu1 %v3538_v62 }
 0x47d   :  { %2754 = vmatpush1.bf16.msra.mxu0 %v3541_v13  ;;  %2786 = vmatpush1.bf16.msra.mxu1 %v3545_v16 }
 0x47e   :  { %2756 = vmatprep.subr.bf16.mxu0 %v3547_v21  ;;  %2788 = vmatprep.subr.bf16.mxu1 %v3550_v39 }
 0x481   :  { %2758 = vmatpush1.bf16.msra.mxu0 %v3553_v20  ;;  %2790 = vmatpush1.bf16.msra.mxu1 %v3557_v23 }
 0x482   :  { %2792 = vmatprep.subr.bf16.mxu0 %v3487_v2  ;;  %2824 = vmatprep.subr.bf16.mxu1 %v3597_v56 }
 0x537   :  { %v1330_v30 = vpop.f32.mrb[6].mxu0  ;;  %v1401_v52 = vpop.f32.mrb[10].mxu1 }
 0x538   :  { %v1406_v45 = vadd.f32 %v1330_v30, %v192_v54  ;;  %v1332_v53 = vpop.f32.mrb[7].mxu0  ;;  %v1403_v58 = vpop.f32.mrb[11].mxu1  ;;  %v1408_v33 = vadd.f32 %v1401_v52, %v194_v3 }
 0x539   :  { %v1407_v7 = vadd.f32 %v1332_v53, %v193_v42  ;;  %v1409_v46 = vadd.f32 %v1403_v58, %v195_v6 }
 0x53a   :  { %v2326_v2 = vmul.f32 -1.442695, %v1406_v45 }
 0x53b   :  { %v2327_v5 = vmul.f32 -1.442695, %v1407_v7  ;;  %v2328_v10 = vmul.f32 -1.442695, %v1409_v46 }
 0x53c   :  { %3026 = vpow2.f32 %v2326_v2 }
 0x53d   :  { %3028 = vpow2.f32 %v2327_v5 }
 0x53e   :  { %3030 = vpow2.f32 %v2328_v10 }
 0x53f   :  { %3032 = vtanh.f32 %v1408_v33 }
 0x546   :  { %v3027_v48 = vpop.eup %3026 }
 0x547   :  { %v3029_v54 = vpop.eup %3028  ;;  %v1413_v30 = vadd.f32 1.0, %v3027_v48 }
 0x548   :  { %v1419_v42 = vadd.f32 1.0, %v3029_v54  ;;  %v3031_v45 = vpop.eup %3030 }
 0x549   :  { %3034 = vrcp.f32 %v1413_v30  ;;  %v3033_v53 = vpop.eup %3032  ;;  %v1426_v5 = vadd.f32 1.0, %v3031_v45 }
 0x54a   :  { %3036 = vrcp.f32 %v1419_v42 }
 0x54b   :  { %3038 = vrcp.f32 %v1426_v5  ;;  %v1921_v5 = vld [vmem:[#allocation4 + $0x20] sm:$0xff] }
 0x553   :  { %v3035_v7 = vpop.eup %3034 }
 0x554   :  { %v3037_v2 = vpop.eup %3036  ;;  %v1430_v18 = vmul.f32 %v3035_v7, %v3033_v53  ;;  %v1918_v53 = vld [vmem:[#allocation4 + $0x8] sm:$0xff] }
 0x555   :  { %v1429_v37 = vmul.f32 %v3037_v2, %v3637_v63  ;;  %v3039_v52 = vpop.eup %3038  ;;  %v1922_v7 = vld [vmem:[#allocation4 + $0x28] sm:$0xff] }
 0x556   :  { %v2855_v2 = vpack.c.bf16 %v1922_v7, %v1918_v53  ;;  %v1963_v53 = vld [vmem:[#allocation4 + $0x170] sm:$0xff]  ;;  %v1966_v7 = vld [vmem:[#allocation4 + $0x188] sm:$0xff] }
 0x557   :  { %v3687_v58 = vadd.f32 %v1430_v18, %v1429_v37  ;;  %v1917_v18 = vld [vmem:[#allocation4] sm:$0xff]  ;;  %v1926_v37 = vld [vmem:[#allocation4 + $0x48] sm:$0xff] }
 0x559   :  { %3040 = vtanh.f32 %v3687_v58 }
 0x563   :  { %v3041_v6 = vpop.eup %3040 }
 0x564   :  { %v3690_v9 = vmul.f32 %v3041_v6, %v3039_v52  ;;  %v1929_v52 = vld [vmem:[#allocation4 + $0x60] sm:$0xff] }
 0x566   :  { %1568 = vmatmul.mubr.f32.vlgmr.msra.gmra.mrb[8].mxu0 %v3690_v9  ;;  %1639 = vmatmul.mubr.f32.vlgmr.msra.gmra.mrb[12].mxu1 %v3690_v9 }
 0x567   :  { %2794 = vmatpush1.bf16.msra.mxu0 %v3489_v19  ;;  %2826 = vmatpush1.bf16.msra.mxu1 %v3599_v17  ;;  %v89_v19 = vpop.permute.xlu1 %88 }
 0x568   :  { %2796 = vmatprep.subr.bf16.mxu0 %v3493_v24  ;;  %2828 = vmatprep.subr.bf16.mxu1 %v3603_v4  ;;  %v142_v24 = vmul.f32 %v3386_v1, %v89_v19 }
 0x569   :  { %1806 = vmatprep.mubr.f32.mxu0 %v3168_v0  ;;  %1877 = vmatprep.mubr.f32.mxu1 %v3168_v0 }
 0x56b   :  { %2798 = vmatpush1.bf16.msra.mxu0 %v3495_v25  ;;  %2830 = vmatpush1.bf16.msra.mxu1 %v3605_v26  ;;  %v143_v25 = vmul.f32 %v3384_v60, %v89_v19 }
 0x56c   :  { %2800 = vmatprep.subr.bf16.mxu0 %v3499_v29  ;;  %2832 = vmatprep.subr.bf16.mxu1 %v3609_v27  ;;  %v196_v29 = vadd.f32 %v3395_v12, %v142_v24 }
 0x56f   :  { %2802 = vmatpush1.bf16.msra.mxu0 %v3501_v15  ;;  %2834 = vmatpush1.bf16.msra.mxu1 %v3611_v47 }
 0x570   :  { %2804 = vmatprep.subr.bf16.mxu0 %v3505_v22  ;;  %2836 = vmatprep.subr.bf16.mxu1 %v3615_v41 }
 0x573   :  { %2806 = vmatpush1.bf16.msra.mxu0 %v3507_v34  ;;  %2838 = vmatpush1.bf16.msra.mxu1 %v3510_v40  ;;  %v197_v34 = vadd.f32 %v3392_v8, %v143_v25  ;;  %v1942_v25 = vld [vmem:[#allocation4 + $0xc8] sm:$0xff] }
 0x574   :  { %2808 = vmatprep.subr.bf16.mxu0 %v3514_v55  ;;  %2840 = vmatprep.subr.bf16.mxu1 %v3516_v31 }
 0x577   :  { %2810 = vmatpush1.bf16.msra.mxu0 %v3518_v38  ;;  %2842 = vmatpush1.bf16.msra.mxu1 %v3521_v49  ;;  %v145_v49 = vmul.f32 %v3401_v36, %v89_v19 }
 0x578   :  { %2812 = vmatprep.subr.bf16.mxu0 %v3525_v43  ;;  %2844 = vmatprep.subr.bf16.mxu1 %v3528_v57 }
 0x57b   :  { %2814 = vmatpush1.bf16.msra.mxu0 %v3530_v59  ;;  %2846 = vmatpush1.bf16.msra.mxu1 %v3533_v11  ;;  %v199_v59 = vadd.f32 %v3407_v50, %v145_v49  ;;  %v144_v11 = vmul.f32 %v3399_v35, %v89_v19  ;;  %v1937_v19 = vld [vmem:[#allocation4 + $0xa0] sm:$0xff]  ;;  %v1950_v49 = vld [vmem:[#allocation4 + $0x108] sm:$0xff] }
 0x57c   :  { %2816 = vmatprep.subr.bf16.mxu0 %v3536_v61  ;;  %2848 = vmatprep.subr.bf16.mxu1 %v3538_v62 }
 0x57d   :  { %v198_v62 = vadd.f32 %v3404_v44, %v144_v11  ;;  %v1953_v11 = vld [vmem:[#allocation4 + $0x120] sm:$0xff] }
 0x57f   :  { %2818 = vmatpush1.bf16.msra.mxu0 %v3541_v13  ;;  %2850 = vmatpush1.bf16.msra.mxu1 %v3545_v16 }
 0x580   :  { %2820 = vmatprep.subr.bf16.mxu0 %v3547_v21  ;;  %2852 = vmatprep.subr.bf16.mxu1 %v3550_v39 }
 0x583   :  { %2822 = vmatpush1.bf16.msra.mxu0 %v3553_v20  ;;  %2854 = vmatpush1.bf16.msra.mxu1 %v3557_v23 }
 0x584   :  { %2888 = vmatprep.subr.bf16.mxu1 %v3597_v56  ;;  %2856 = vmatprep.subr.bf16.mxu0 %v2855_v2 }
 0x639   :  { %v1569_v15 = vpop.f32.mrb[8].mxu0  ;;  %v1640_v22 = vpop.f32.mrb[12].mxu1 }
 0x63a   :  { %v1645_v40 = vadd.f32 %v1569_v15, %v196_v29  ;;  %v1571_v55 = vpop.f32.mrb[9].mxu0  ;;  %v1642_v31 = vpop.f32.mrb[13].mxu1  ;;  %v1647_v16 = vadd.f32 %v1640_v22, %v198_v62  ;;  %v1946_v29 = vld [vmem:[#allocation4 + $0xe8] sm:$0xff]  ;;  %v1941_v22 = vld [vmem:[#allocation4 + $0xc0] sm:$0xff] }
 0x63b   :  { %v1646_v38 = vadd.f32 %v1571_v55, %v197_v34  ;;  %v1648_v61 = vadd.f32 %v1642_v31, %v199_v59  ;;  %v2867_v15 = vpack.c.bf16 %v1946_v29, %v1942_v25  ;;  %v1945_v34 = vld [vmem:[#allocation4 + $0xe0] sm:$0xff]  ;;  %v1943_v55 = vld [vmem:[#allocation4 + $0xd0] sm:$0xff]  ;;  %v1976_v29 = vld [vmem:[#allocation4 + $0x1d8] sm:$0xff] }
 0x63c   :  { %v2329_v43 = vmul.f32 -1.442695, %v1645_v40  ;;  %v2869_v40 = vpack.c.bf16 %v1945_v34, %v1941_v22  ;;  %v1947_v31 = vld [vmem:[#allocation4 + $0xf0] sm:$0xff]  ;;  %v1949_v59 = vld [vmem:[#allocation4 + $0x100] sm:$0xff] }
 0x63d   :  { %v2330_v57 = vmul.f32 -1.442695, %v1646_v38  ;;  %v2331_v13 = vmul.f32 -1.442695, %v1648_v61  ;;  %v2901_v38 = vpack.c.bf16 %v1947_v31, %v1943_v55  ;;  %v1952_v61 = vld [vmem:[#allocation4 + $0x118] sm:$0xff]  ;;  %v2873_v62 = vpack.c.bf16 %v1953_v11, %v1949_v59  ;;  %v1977_v25 = vld [vmem:[#allocation4 + $0x1e0] sm:$0xff] }
 0x63e   :  { %3042 = vpow2.f32 %v2329_v43  ;;  %v1954_v43 = vld [vmem:[#allocation4 + $0x128] sm:$0xff]  ;;  %v1975_v22 = vld [vmem:[#allocation4 + $0x1d0] sm:$0xff]  ;;  %v2160_v31 = vld [vmem:[#allocation7] sm:$0xff] }
 0x63f   :  { %3044 = vpow2.f32 %v2330_v57  ;;  %v2871_v57 = vpack.c.bf16 %v1954_v43, %v1950_v49  ;;  %v1979_v34 = vld [vmem:[#allocation4 + $0x1f0] sm:$0xff] }
 0x640   :  { %3046 = vpow2.f32 %v2331_v13  ;;  %v1956_v13 = vld [vmem:[#allocation4 + $0x138] sm:$0xff]  ;;  %v2917_v43 = vpack.c.bf16 %v1979_v34, %v1975_v22 }
 0x641   :  { %3048 = vtanh.f32 %v1647_v16  ;;  %v1951_v16 = vld [vmem:[#allocation4 + $0x110] sm:$0xff]  ;;  %v2167_v22 = vld [vmem:[#allocation7 + $0x38] sm:$0xff] }
 0x648   :  { %v3043_v21 = vpop.eup %3042 }
 0x649   :  { %v3045_v39 = vpop.eup %3044  ;;  %v1652_v20 = vadd.f32 1.0, %v3043_v21  ;;  %v1955_v21 = vld [vmem:[#allocation4 + $0x130] sm:$0xff] }
 0x64a   :  { %v1658_v23 = vadd.f32 1.0, %v3045_v39  ;;  %v3047_v56 = vpop.eup %3046  ;;  %v2903_v39 = vpack.c.bf16 %v1956_v13, %v1952_v61 }
 0x64b   :  { %3050 = vrcp.f32 %v1652_v20  ;;  %v3049_v63 = vpop.eup %3048  ;;  %v1665_v33 = vadd.f32 1.0, %v3047_v56  ;;  %v2905_v20 = vpack.c.bf16 %v1955_v21, %v1951_v16  ;;  %v1962_v56 = vld [vmem:[#allocation4 + $0x168] sm:$0xff] }
 0x64c   :  { %3052 = vrcp.f32 %v1658_v23  ;;  %v1958_v23 = vld [vmem:[#allocation4 + $0x148] sm:$0xff] }
 0x64d   :  { %3054 = vrcp.f32 %v1665_v33  ;;  %v1964_v33 = vld [vmem:[#allocation4 + $0x178] sm:$0xff] }
 0x655   :  { %v3051_v46 = vpop.eup %3050 }
 0x656   :  { %v3053_v3 = vpop.eup %3052  ;;  %v1669_v10 = vmul.f32 %v3051_v46, %v3049_v63  ;;  %v1957_v63 = vld [vmem:[#allocation4 + $0x140] sm:$0xff]  ;;  %v2875_v46 = vpack.c.bf16 %v1962_v56, %v1958_v23 }
 0x657   :  { %v1668_v48 = vmul.f32 %v3053_v3, %v3687_v58  ;;  %v3055_v30 = vpop.eup %3054  ;;  %v1961_v3 = vld [vmem:[#allocation4 + $0x160] sm:$0xff] }
 0x659   :  { %v3736_v54 = vadd.f32 %v1669_v10, %v1668_v48  ;;  %v1960_v10 = vld [vmem:[#allocation4 + $0x158] sm:$0xff]  ;;  %v2877_v48 = vpack.c.bf16 %v1961_v3, %v1957_v63 }
 0x65b   :  { %3056 = vtanh.f32 %v3736_v54 }
 0x665   :  { %v3057_v42 = vpop.eup %3056 }
 0x666   :  { %v3739_v45 = vmul.f32 %v3057_v42, %v3055_v30  ;;  %v2907_v30 = vpack.c.bf16 %v1964_v33, %v1960_v10  ;;  %v1959_v42 = vld [vmem:[#allocation4 + $0x150] sm:$0xff] }
 0x667   :  { %v2909_v2 = vpack.c.bf16 %v1963_v53, %v1959_v42 }
 0x668   :  { %1807 = vmatmul.mubr.f32.vlgmr.msra.gmra.mrb[10].mxu0 %v3739_v45  ;;  %1878 = vmatmul.mubr.f32.vlgmr.msra.gmra.mrb[14].mxu1 %v3739_v45 }
 0x669   :  { %2890 = vmatpush1.bf16.msra.mxu1 %v3599_v17  ;;  %2045 = vmatprep.mubr.f32.mxu0 %v3168_v0  ;;  %v2857_v17 = vpack.c.bf16 %v1921_v5, %v1917_v18  ;;  %v1970_v18 = vld [vmem:[#allocation4 + $0x1a8] sm:$0xff]  ;;  %v1965_v5 = vld [vmem:[#allocation4 + $0x180] sm:$0xff] }
 0x66a   :  { %2892 = vmatprep.subr.bf16.mxu1 %v3603_v4  ;;  %2116 = vmatprep.mubr.f32.mxu1 %v3168_v0  ;;  %v1930_v4 = vld [vmem:[#allocation4 + $0x68] sm:$0xff]  ;;  %v1925_v0 = vld [vmem:[#allocation4 + $0x40] sm:$0xff] }
 0x66b   :  { %2858 = vmatpush1.bf16.msra.mxu0 %v2857_v17  ;;  %v2859_v58 = vpack.c.bf16 %v1930_v4, %v1926_v37  ;;  %v1969_v17 = vld [vmem:[#allocation4 + $0x1a0] sm:$0xff]  ;;  %v2879_v37 = vpack.c.bf16 %v1970_v18, %v1966_v7 }
 0x66c   :  { %v2881_v4 = vpack.c.bf16 %v1969_v17, %v1965_v5 }
 0x66d   :  { %2894 = vmatpush1.bf16.msra.mxu1 %v3605_v26  ;;  %v2861_v26 = vpack.c.bf16 %v1929_v52, %v1925_v0  ;;  %2860 = vmatprep.subr.bf16.mxu0 %v2859_v58  ;;  %v1968_v58 = vld [vmem:[#allocation4 + $0x198] sm:$0xff]  ;;  %v1967_v52 = vld [vmem:[#allocation4 + $0x190] sm:$0xff] }
 0x66e   :  { %2896 = vmatprep.subr.bf16.mxu1 %v3609_v27  ;;  %v1934_v27 = vld [vmem:[#allocation4 + $0x88] sm:$0xff]  ;;  %v1972_v0 = vld [vmem:[#allocation4 + $0x1b8] sm:$0xff] }
 0x66f   :  { %2862 = vmatpush1.bf16.msra.mxu0 %v2861_v26  ;;  %v2911_v26 = vpack.c.bf16 %v1972_v0, %v1968_v58 }
 0x671   :  { %2898 = vmatpush1.bf16.msra.mxu1 %v3611_v47  ;;  %v1938_v47 = vld [vmem:[#allocation4 + $0xa8] sm:$0xff] }
 0x672   :  { %2900 = vmatprep.subr.bf16.mxu1 %v3615_v41  ;;  %v2863_v6 = vpack.c.bf16 %v1938_v47, %v1934_v27  ;;  %v1933_v41 = vld [vmem:[#allocation4 + $0x80] sm:$0xff]  ;;  %v1971_v27 = vld [vmem:[#allocation4 + $0x1b0] sm:$0xff]  ;;  %v1974_v47 = vld [vmem:[#allocation4 + $0x1c8] sm:$0xff] }
 0x673   :  { %v2865_v24 = vpack.c.bf16 %v1937_v19, %v1933_v41  ;;  %v2913_v41 = vpack.c.bf16 %v1971_v27, %v1967_v52  ;;  %v2162_v27 = vld [vmem:[#allocation7 + $0x10] sm:$0xff] }
 0x674   :  { %2864 = vmatprep.subr.bf16.mxu0 %v2863_v6  ;;  %v1978_v6 = vld [vmem:[#allocation4 + $0x1e8] sm:$0xff] }
 0x675   :  { %2866 = vmatpush1.bf16.msra.mxu0 %v2865_v24  ;;  %2902 = vmatpush1.bf16.msra.mxu1 %v2901_v38  ;;  %v2883_v19 = vpack.c.bf16 %v1978_v6, %v1974_v47  ;;  %v1973_v24 = vld [vmem:[#allocation4 + $0x1c0] sm:$0xff]  ;;  %v2161_v38 = vld [vmem:[#allocation7 + $0x8] sm:$0xff]  ;;  %v2163_v47 = vld [vmem:[#allocation7 + $0x18] sm:$0xff] }
 0x676   :  { %2868 = vmatprep.subr.bf16.mxu0 %v2867_v15  ;;  %2904 = vmatprep.subr.bf16.mxu1 %v2903_v39  ;;  %v1980_v15 = vld [vmem:[#allocation4 + $0x1f8] sm:$0xff]  ;;  %v2919_v49 = vpack.c.bf16 %v2161_v38, %v2160_v31  ;;  %v2170_v38 = vld [vmem:[#allocation7 + $0x50] sm:$0xff] }
 0x677   :  { %v2915_v55 = vpack.c.bf16 %v1980_v15, %v1976_v29  ;;  %v2165_v29 = vld [vmem:[#allocation7 + $0x28] sm:$0xff]  ;;  %v2166_v15 = vld [vmem:[#allocation7 + $0x30] sm:$0xff] }
 0x678   :  { %v2931_v34 = vpack.c.bf16 %v2167_v22, %v2166_v15 }
 0x679   :  { %2870 = vmatpush1.bf16.msra.mxu0 %v2869_v40  ;;  %2906 = vmatpush1.bf16.msra.mxu1 %v2905_v20  ;;  %v2885_v40 = vpack.c.bf16 %v1977_v25, %v1973_v24  ;;  %v2923_v24 = vpack.c.bf16 %v2163_v47, %v2162_v27  ;;  %v2164_v25 = vld [vmem:[#allocation7 + $0x20] sm:$0xff] }
 0x67a   :  { %2872 = vmatprep.subr.bf16.mxu0 %v2871_v57  ;;  %2908 = vmatprep.subr.bf16.mxu1 %v2907_v30  ;;  %v94_v57 = vpop.permute.xlu0 %93 }
 0x67b   :  { %v146_v59 = vmul.f32 %v3386_v1, %v94_v57  ;;  %v147_v11 = vmul.f32 %v3384_v60, %v94_v57  ;;  %v149_v23 = vmul.f32 %v3401_v36, %v94_v57  ;;  %v148_v10 = vmul.f32 %v3399_v35, %v94_v57 }
 0x67d   :  { %2874 = vmatpush1.bf16.msra.mxu0 %v2873_v62  ;;  %2910 = vmatpush1.bf16.msra.mxu1 %v2909_v2  ;;  %v200_v61 = vadd.f32 %v3395_v12, %v146_v59  ;;  %v201_v16 = vadd.f32 %v3392_v8, %v147_v11  ;;  %v203_v3 = vadd.f32 %v3407_v50, %v149_v23  ;;  %v2173_v59 = vld [vmem:[#allocation7 + $0x68] sm:$0xff]  ;;  %v2174_v11 = vld [vmem:[#allocation7 + $0x70] sm:$0xff] }
 0x67e   :  { %2876 = vmatprep.subr.bf16.mxu0 %v2875_v46  ;;  %2912 = vmatprep.subr.bf16.mxu1 %v2911_v26 }
 0x681   :  { %2878 = vmatpush1.bf16.msra.mxu0 %v2877_v48  ;;  %2914 = vmatpush1.bf16.msra.mxu1 %v2913_v41  ;;  %v202_v48 = vadd.f32 %v3404_v44, %v148_v10 }
 0x682   :  { %2880 = vmatprep.subr.bf16.mxu0 %v2879_v37  ;;  %2916 = vmatprep.subr.bf16.mxu1 %v2915_v55  ;;  %v2169_v55 = vld [vmem:[#allocation7 + $0x48] sm:$0xff] }
 0x685   :  { %2882 = vmatpush1.bf16.msra.mxu0 %v2881_v4  ;;  %2918 = vmatpush1.bf16.msra.mxu1 %v2917_v43  ;;  %v2171_v43 = vld [vmem:[#allocation7 + $0x58] sm:$0xff] }
 0x686   :  { %2884 = vmatprep.subr.bf16.mxu0 %v2883_v19  ;;  %v2939_v57 = vpack.c.bf16 %v2171_v43, %v2170_v38 }
 0x689   :  { %2886 = vmatpush1.bf16.msra.mxu0 %v2885_v40  ;;  %v2168_v40 = vld [vmem:[#allocation7 + $0x40] sm:$0xff] }
 0x68a   :  { %2920 = vmatprep.subr.bf16.mxu0 %v2919_v49  ;;  %v2935_v31 = vpack.c.bf16 %v2169_v55, %v2168_v40 }
 0x73b   :  { %v1808_v62 = vpop.f32.mrb[10].mxu0  ;;  %v1879_v13 = vpop.f32.mrb[14].mxu1 }
 0x73c   :  { %v1884_v21 = vadd.f32 %v1808_v62, %v200_v61  ;;  %v1810_v39 = vpop.f32.mrb[11].mxu0  ;;  %v1881_v20 = vpop.f32.mrb[15].mxu1  ;;  %v1886_v42 = vadd.f32 %v1879_v13, %v202_v48  ;;  %v2175_v61 = vld [vmem:[#allocation7 + $0x78] sm:$0xff] }
 0x73d   :  { %v1885_v56 = vadd.f32 %v1810_v39, %v201_v16  ;;  %v1887_v33 = vadd.f32 %v1881_v20, %v203_v3  ;;  %v2947_v62 = vpack.c.bf16 %v2175_v61, %v2174_v11  ;;  %v99_v13 = vpop.permute.xlu1 %98 }
 0x73e   :  { %v2332_v63 = vmul.f32 -1.442695, %v1884_v21  ;;  %v150_v16 = vmul.f32 %v3386_v1, %v99_v13  ;;  %v151_v21 = vmul.f32 %v3384_v60, %v99_v13  ;;  %v152_v60 = vmul.f32 %v3399_v35, %v99_v13 }
 0x73f   :  { %v2333_v46 = vmul.f32 -1.442695, %v1885_v56  ;;  %v2334_v30 = vmul.f32 -1.442695, %v1887_v33 }
 0x740   :  { %3058 = vpow2.f32 %v2332_v63  ;;  %v204_v39 = vadd.f32 %v3395_v12, %v150_v16  ;;  %v206_v12 = vadd.f32 %v3404_v44, %v152_v60  ;;  %v2338_v44 = vld [vmem:[%s3801_s5] ss:$0 sm:$0xff]  ;;  %s3170_s5 = smov [#allocation9]  }
 0x741   :  { %3060 = vpow2.f32 %v2333_v46  ;;  %s2301_s18 = sshll.u32 %s3170_s5, 4  ;;  %s2302_s18 = int_to_ptr.vmem [resolvable:$true] %s2301_s18 }
 0x742   :  { %3062 = vpow2.f32 %v2334_v30  ;;  %s3134_s19 = scalar_lea.vmem %s2302_s18, 1024  ;;  %p3139_p3 = scmp.lt.s32.totalorder %s2302_s18, %s2302_s18 }
 0x743   :  { %3064 = vtanh.f32 %v1886_v42  ;;  %p3135_p2 = scmp.ne.s32.totalorder %s2302_s18, %s3134_s19  ;;  %p3140_p4 = scmp.lt.s32.totalorder %s3134_s19, %s3134_s19 }
 0x745   :  { %p3141_p5 = por %p3140_p4, %p3139_p3 }
 0x747   :  { %p3142_p6 = pnand %p3141_p5, %p3135_p2 }
 0x74a   :  { %v3059_v53 = vpop.eup %3058 }
 0x74b   :  { %v3061_v7 = vpop.eup %3060  ;;  %v1891_v2 = vadd.f32 1.0, %v3059_v53 }
 0x74c   :  { %v1897_v18 = vadd.f32 1.0, %v3061_v7  ;;  %v3063_v5 = vpop.eup %3062 }
 0x74d   :  { %3066 = vrcp.f32 %v1891_v2  ;;  %v3065_v17 = vpop.eup %3064  ;;  %v1904_v0 = vadd.f32 1.0, %v3063_v5 }
 0x74e   :  { %3068 = vrcp.f32 %v1897_v18 }
 0x74f   :  { %3070 = vrcp.f32 %v1904_v0 }
 0x757   :  { %v3067_v37 = vpop.eup %3066 }
 0x758   :  { %v3069_v4 = vpop.eup %3068  ;;  %v1908_v58 = vmul.f32 %v3067_v37, %v3065_v17 }
 0x759   :  { %v1907_v52 = vmul.f32 %v3069_v4, %v3736_v54  ;;  %v3071_v6 = vpop.eup %3070  ;;  %v2927_v54 = vpack.c.bf16 %v2165_v29, %v2164_v25 }
 0x75b   :  { %v3760_v26 = vadd.f32 %v1908_v58, %v1907_v52 }
 0x75d   :  { %3072 = vtanh.f32 %v3760_v26 }
 0x767   :  { %v3073_v41 = vpop.eup %3072 }
 0x768   :  { %v1911_v19 = vmul.f32 %v3073_v41, %v3071_v6 }
 0x76a   :  { %2046 = vmatmul.mubr.f32.vlgmr.msra.gmra.mrb[12].mxu0 %v1911_v19  ;;  %2117 = vmatmul.mubr.f32.vlgmr.msra.gmra.mrb[16].mxu1 %v1911_v19 }
 0x76b   :  { %2922 = vmatpush3.bf16.msra.mxu0 %v2919_v49  ;;  %2395 = vmatprep.mubr.f32.mxu0 %v3414_v32  ;;  %v2172_v49 = vld [vmem:[#allocation7 + $0x60] sm:$0xff] }
 0x76c   :  { %2924 = vmatprep.subr.bf16.mxu0 %v2923_v24  ;;  %v2943_v32 = vpack.c.bf16 %v2173_v59, %v2172_v49 }
 0x76f   :  { %2926 = vmatpush3.bf16.msra.mxu0 %v2923_v24 }
 0x770   :  { %2928 = vmatprep.subr.bf16.mxu0 %v2927_v54 }
 0x773   :  { %2930 = vmatpush3.bf16.msra.mxu0 %v2927_v54 }
 0x774   :  { %2932 = vmatprep.subr.bf16.mxu0 %v2931_v34 }
 0x777   :  { %2934 = vmatpush3.bf16.msra.mxu0 %v2931_v34 }
 0x778   :  { %2936 = vmatprep.subr.bf16.mxu0 %v2935_v31 }
 0x77b   :  { %2938 = vmatpush3.bf16.msra.mxu0 %v2935_v31 }
 0x77c   :  { %2940 = vmatprep.subr.bf16.mxu0 %v2939_v57 }
 0x77f   :  { %2942 = vmatpush3.bf16.msra.mxu0 %v2939_v57 }
 0x780   :  { %2944 = vmatprep.subr.bf16.mxu0 %v2943_v32 }
 0x783   :  { %2946 = vmatpush3.bf16.msra.mxu0 %v2943_v32 }
 0x784   :  { %2948 = vmatprep.subr.bf16.mxu0 %v2947_v62 }
 0x787   :  { %2950 = vmatpush3.bf16.msra.mxu0 %v2947_v62 }
 0x78a   :  { %2396 = vmatmul.mubr.f32.vlgmr.msra.gmra.mrb[14].mxu0 %v3475_v14  ;;  %v205_v14 = vadd.f32 %v3392_v8, %v151_v21 }
 0x78b   :  { %2398 = vmatprep.mubr.f32.mxu0 %v3575_v51 }
 0x78e   :  { %2399 = vmatmul.mubr.f32.gmra.mrb[16].mxu0 %v3640_v28  ;;  %v153_v28 = vmul.f32 %v3401_v36, %v99_v13 }
 0x78f   :  { %2401 = vmatprep.mubr.f32.mxu0 %v3690_v9 }
 0x790   :  { %v207_v1 = vadd.f32 %v3407_v50, %v153_v28 }
 0x792   :  { %2402 = vmatmul.mubr.f32.gmra.mrb[18].mxu0 %v3739_v45 }
 0x793   :  { %2404 = vmatprep.mubr.f32.mxu0 %v1911_v19 }
 0x83d   :  { %v2047_v20 = vpop.f32.mrb[12].mxu0  ;;  %v2118_v23 = vpop.f32.mrb[16].mxu1 }
 0x83e   :  { %v2123_v56 = vadd.f32 %v2047_v20, %v204_v39  ;;  %v2049_v51 = vpop.f32.mrb[13].mxu0  ;;  %v2120_v63 = vpop.f32.mrb[17].mxu1  ;;  %v2125_v33 = vadd.f32 %v2118_v23, %v206_v12 }
 0x83f   :  { %v2124_v9 = vadd.f32 %v2049_v51, %v205_v14  ;;  %v2126_v3 = vadd.f32 %v2120_v63, %v207_v1 }
 0x840   :  { %v2335_v46 = vmul.f32 -1.442695, %v2123_v56 }
 0x841   :  { %v2336_v45 = vmul.f32 -1.442695, %v2124_v9  ;;  %v2337_v10 = vmul.f32 -1.442695, %v2126_v3 }
 0x842   :  { %3074 = vpow2.f32 %v2335_v46 }
 0x843   :  { %3076 = vpow2.f32 %v2336_v45 }
 0x844   :  { %3078 = vpow2.f32 %v2337_v10 }
 0x845   :  { %3080 = vtanh.f32 %v2125_v33 }
 0x84c   :  { %v3075_v8 = vpop.eup %3074 }
 0x84d   :  { %v3077_v48 = vpop.eup %3076  ;;  %v2130_v30 = vadd.f32 1.0, %v3075_v8 }
 0x84e   :  { %v2136_v36 = vadd.f32 1.0, %v3077_v48  ;;  %v3079_v42 = vpop.eup %3078 }
 0x84f   :  { %3082 = vrcp.f32 %v2130_v30  ;;  %v3081_v53 = vpop.eup %3080  ;;  %v2143_v18 = vadd.f32 1.0, %v3079_v42 }
 0x850   :  { %3084 = vrcp.f32 %v2136_v36 }
 0x851   :  { %3086 = vrcp.f32 %v2143_v18 }
 0x859   :  { %v3083_v7 = vpop.eup %3082 }
 0x85a   :  { %v3085_v2 = vpop.eup %3084  ;;  %v2147_v50 = vmul.f32 %v3083_v7, %v3081_v53 }
 0x85b   :  { %v2146_v35 = vmul.f32 %v3085_v2, %v3760_v26  ;;  %v3087_v24 = vpop.eup %3086 }
 0x85d   :  { %v2397_v5 = vpop.f32.mrb[14].mxu0  ;;  %v2148_v17 = vadd.f32 %v2147_v50, %v2146_v35 }
 0x85e   :  { %v2255_v37 = vadd.f32 %v2397_v5, %v2338_v44  ;;  %v2249_v4 = vpop.f32.mrb[15].mxu0 }
 0x85f   :  { %v2250_v58 = vadd.f32 %v2338_v44, %v2249_v4  ;;  %3088 = vtanh.f32 %v2148_v17 }
 0x860   :  { %2289 = vst [vmem:[#allocation9 + $0x8] sm:$0xff] %v2255_v37 }
 0x861   :  { %2288 = vst [vmem:[#allocation9] sm:$0xff] %v2250_v58  ;;  %v2400_v0 = vpop.f32.mrb[16].mxu0 }
 0x862   :  { %v2265_v52 = vadd.f32 %v2400_v0, %v2338_v44  ;;  %v2259_v27 = vpop.f32.mrb[17].mxu0 }
 0x863   :  { %v2260_v47 = vadd.f32 %v2338_v44, %v2259_v27 }
 0x864   :  { %2291 = vst [vmem:[#allocation9 + $0x18] sm:$0xff] %v2265_v52 }
 0x865   :  { %2290 = vst [vmem:[#allocation9 + $0x10] sm:$0xff] %v2260_v47  ;;  %v2403_v26 = vpop.f32.mrb[18].mxu0 }
 0x866   :  { %v2275_v6 = vadd.f32 %v2403_v26, %v2338_v44  ;;  %v2269_v41 = vpop.f32.mrb[19].mxu0 }
 0x867   :  { %v2270_v19 = vadd.f32 %v2338_v44, %v2269_v41 }
 0x868   :  { %2293 = vst [vmem:[#allocation9 + $0x28] sm:$0xff] %v2275_v6 }
 0x869   :  { %v3089_v25 = vpop.eup %3088  ;;  %2292 = vst [vmem:[#allocation9 + $0x20] sm:$0xff] %v2270_v19 }
 0x86a   :  { %v2150_v29 = vmul.f32 %v3089_v25, %v3087_v24 }
 0x86c   :  { %2405 = vmatmul.mubr.f32.gmra.mrb[20].mxu0 %v2150_v29 }
 0x93f   :  { %v2406_v54 = vpop.f32.mrb[20].mxu0 }
 0x940   :  { %v2285_v15 = vadd.f32 %v2406_v54, %v2338_v44  ;;  %v2279_v22 = vpop.f32.mrb[21].mxu0 }
 0x941   :  { %v2280_v34 = vadd.f32 %v2338_v44, %v2279_v22 }
 0x942   :  { %2295 = vst [vmem:[#allocation9 + $0x38] sm:$0xff] %v2285_v15 }
 0x943   :  { %2294 = vst [vmem:[#allocation9 + $0x30] sm:$0xff] %v2280_v34 }
 0x944   :  { %3145 = shalt.err (!%p3142_p6)
}
 0x945   :  { %s3146_s23 = scalar_lea.hbm %s3802_s6, 1024 }
 0x946   :  { %p3147_p7 = scmp.ne.s32.totalorder %s3802_s6, %s3146_s23  ;;  %p3150_p8 = scmp.lt.u32.totalorder %s3146_s23, %s3802_s6 }
 0x948   :  { %p3152_p9 = pnand %p3150_p8, %p3147_p7 }
 0x94a   :  { %3155 = shalt.err (!%p3152_p9)
}
 0x94b   :  { %2307 = dma.vmem_to_hbm [thread:$0]  %s2302_s18, 1024, %s3802_s6, [#allocation6], %s3166_s2, %s3166_s2, %s3167_s21  }
 0x94c   :  { %3160 = dma.done.wait [#allocation6], 1024  }
 0x94d   :  { %3161 = vsyncadd [#allocation6], 4294966272 }
 0x94e   :  { %2311 = vsyncpa [#allocation5], 1 }
 0x94f   :  { %2312 = vsyncpa [#allocation8], 1 }
 0x950   :  { %2313 = vsyncpa [#allocation6], 1 }

</bundles_post_ra>
